<compile_context>
chip_gen: v7x
topology: tpu7x:2x2x1
jax: 0.10.0
libtpu: 0.0.40
codegen_flags: <defaults>
</compile_context>

<pallas_src>
import functools

import jax
import jax.numpy as jnp
from jax import lax
from jax.experimental import pallas as pl
from jax.experimental.pallas import tpu as pltpu


def _random_shift_kernel(pad, nb, n_total, shift_ref, x_ref, o_ref):
    # shift_ref: (N, 2) int32 in SMEM (scalar-prefetched): [:,0]=x (col) shift,
    #            [:,1]=y (row) shift, integers in [0, 2*pad].
    # x_ref:     (nb, C, H, W) unpadded input block in VMEM (original dtype).
    # o_ref:     (nb, C, H, W) float32 output block in VMEM.
    _, c, h, w = x_ref.shape
    base = pl.program_id(0) * nb

    # Small index vectors, hoisted once per grid step (reused by every image).
    row_idx = lax.broadcasted_iota(jnp.int32, (1, h, 1), 1)
    col_idx = lax.broadcasted_iota(jnp.int32, (1, 1, w), 2)

    def make_branch(s, axis, size):
        # f(img, idx)[..., k, ...] = img[..., clip(k + s, 0, size-1), ...] along `axis`.
        # `s` is a compile-time constant, so the rotate amount and the border
        # predicate are static; only the one taken branch executes per image.
        amt = (-s) % size                     # jnp.roll convention, non-negative

        def branch(a, idx):
            if s == 0:
                return a
            rolled = pltpu.roll(a, amt, axis=axis)        # XLU rotate (slot otherwise idle)
            bidx = jnp.broadcast_to(idx, a.shape)         # int32 broadcast (cheap VPU)
            if s > 0:
                edge = lax.slice_in_dim(a, size - 1, size, axis=axis)
                return jnp.where(bidx >= size - s, jnp.broadcast_to(edge, a.shape), rolled)
            edge = lax.slice_in_dim(a, 0, 1, axis=axis)
            return jnp.where(bidx < -s, jnp.broadcast_to(edge, a.shape), rolled)

        return branch

    row_branches = [make_branch(s0 - pad, 1, h) for s0 in range(2 * pad + 1)]
    col_branches = [make_branch(s0 - pad, 2, w) for s0 in range(2 * pad + 1)]

    def body(i, carry):
        g = base + i                                   # global image index
        gs = jnp.minimum(g, n_total - 1)               # keep SMEM read in bounds on the tail block
        sx = shift_ref[gs, 0]
        sy = shift_ref[gs, 1]

        @pl.when(g < n_total)                          # cdiv-grid tail guard
        def _():
            img = x_ref[i]                                        # (C, H, W), input dtype
            img = lax.switch(sy, row_branches, img, row_idx)      # clamped row (sublane) shift
            img = lax.switch(sx, col_branches, img, col_idx)      # clamped col (lane) shift
            o_ref[i] = img.astype(jnp.float32)                    # cast only at the final store
        return carry

    lax.fori_loop(0, nb, body, None, unroll=nb <= 8)


def _plan(n, c, h, w, in_dtype):
    """Pick images-per-step (nb), grid length and a matching VMEM limit.

    Per-image VMEM cost counts the lane/sublane-padded pipeline-buffer layout
    and double buffering (2x input block + 2x f32 output block).  The budget is
    sized to stay comfortable on v7x's 64 MiB VMEM (v5e/v6e have 128 MiB)."""
    itemsize = jnp.dtype(in_dtype).itemsize
    sub = -(-h // 8) * 8
    lane = -(-w // 128) * 128
    per_img = 2 * c * sub * lane * (itemsize + 4)      # 2x(in) + 2x(out f32)
    budget = 24 << 20
    nb = max(1, budget // per_img)
    if n >= 2:
        nb = min(nb, (n + 1) // 2)       # keep >= 2 grid steps: v7x's 2 TCs share the batch axis
    nb = int(min(nb, n))
    steps = pl.cdiv(n, nb)
    if steps > 2 and steps % 2 == 1:     # prefer an even step count for 2-TC balance
        nb = int(pl.cdiv(n, steps + 1))
        steps = pl.cdiv(n, nb)
    vmem_limit = int(min(max(nb * per_img + (4 << 20), 32 << 20), 56 << 20))
    return nb, int(steps), vmem_limit


def random_shifts_aug(x, shift, pad):
    """x: (N, C, H, W) any real dtype; shift: (N, 2) int32 in [0, 2*pad].
    Returns float32 (N, C, H, W), matching the PyTorch module (x.float())."""
    n, c, h, w = x.shape
    assert h == w

    nb, steps, vmem_limit = _plan(n, c, h, w, x.dtype)
    kernel = functools.partial(_random_shift_kernel, pad, nb, n)

    return pl.pallas_call(
        kernel,
        out_shape=jax.ShapeDtypeStruct((n, c, h, w), jnp.float32),
        grid_spec=pltpu.PrefetchScalarGridSpec(
            num_scalar_prefetch=1,
            grid=(steps,),
            in_specs=[pl.BlockSpec((nb, c, h, w), lambda b, s: (b, 0, 0, 0))],
            out_specs=pl.BlockSpec((nb, c, h, w), lambda b, s: (b, 0, 0, 0)),
        ),
        compiler_params=pltpu.CompilerParams(
            dimension_semantics=("parallel",),
            vmem_limit_bytes=vmem_limit,
        ),
    )(shift.astype(jnp.int32), x)


def _reference(x, shift, pad):
    # Pure-JAX reference of the shifted-crop-with-replicate-border semantics.
    n, c, h, w = x.shape
    xf = x.astype(jnp.float32)
    rows = jnp.clip(jnp.arange(h)[None, :] + shift[:, 1:2] - pad, 0, h - 1)   # (n, h)
    cols = jnp.clip(jnp.arange(w)[None, :] + shift[:, 0:1] - pad, 0, w - 1)   # (n, w)
    return xf[jnp.arange(n)[:, None, None, None],
              jnp.arange(c)[None, :, None, None],
              rows[:, None, :, None],
              cols[:, None, None, :]]


if __name__ == "__main__":
    pad = 4
    n, c, h, w = 2, 4, 16, 16

    key = jax.random.PRNGKey(0)
    kx, ks = jax.random.split(key)
    x = jax.random.normal(kx, (n, c, h, w), dtype=jnp.float32)
    # TODO(synk): torch.randint's RNG stream is not reproducible here; the per-image
    # integer shift in [0, 2*pad] is taken as an explicit input drawn with jax.random.
    shift = jax.random.randint(ks, (n, 2), 0, 2 * pad + 1, dtype=jnp.int32)

    out = jax.block_until_ready(random_shifts_aug(x, shift, pad))

    ref = _reference(x, shift, pad)
    assert out.shape == (n, c, h, w) and out.dtype == jnp.float32
    assert jnp.allclose(out, ref, atol=1e-6), "kernel does not match reference"

    print("KERNEL_OK")
</pallas_src>

<mosaic_0001>
module attributes {stable_mosaic.version = 11 : i64} {
  func.func @_random_shift_kernel(%arg0: i32, %arg1: memref<2x2xi32, #tpu.memory_space<smem>>, %arg2: memref<1x4x16x16xf32, #tpu.memory_space<vmem>>, %arg3: memref<1x4x16x16xf32, #tpu.memory_space<vmem>>) attributes {dimension_semantics = [#tpu.dimension_semantics<parallel>], iteration_bounds = array<i64: 2>, scalar_prefetch = 1 : i64, scratch_operands = 0 : i64, tpu.core_type = #tpu.core_type<tc>, window_params = [{transform_indices = @transform_0, window_bounds = array<i64: 1, 4, 16, 16>}, {transform_indices = @transform_1, window_bounds = array<i64: 1, 4, 16, 16>}]} {
    %c1_i32 = arith.constant 1 : i32
    %0 = arith.muli %arg0, %c1_i32 : i32
    %1 = tpu.iota {dimensions = array<i32: 1>} : vector<1x16x1xi32>
    %2 = tpu.iota {dimensions = array<i32: 2>} : vector<1x1x16xi32>
    %c0_i32 = arith.constant 0 : i32
    %3 = arith.addi %0, %c0_i32 : i32
    %c1_i32_0 = arith.constant 1 : i32
    %4 = arith.minsi %3, %c1_i32_0 : i32
    %5 = arith.index_cast %4 : i32 to index
    %c0 = arith.constant 0 : index
    %6 = memref.load %arg1[%5, %c0] : memref<2x2xi32, #tpu.memory_space<smem>>
    %7 = arith.index_cast %4 : i32 to index
    %c1 = arith.constant 1 : index
    %8 = memref.load %arg1[%7, %c1] : memref<2x2xi32, #tpu.memory_space<smem>>
    %c2_i32 = arith.constant 2 : i32
    %9 = arith.cmpi slt, %3, %c2_i32 : i32
    %10 = arith.extui %9 : i1 to i32
    %c0_i32_1 = arith.constant 0 : i32
    %11 = arith.cmpi ne, %10, %c0_i32_1 : i32
    scf.if %11 {
      %12 = arith.index_cast %c0_i32 : i32 to index
      %c0_3 = arith.constant 0 : index
      %c0_4 = arith.constant 0 : index
      %c0_5 = arith.constant 0 : index
      %13 = vector.load %arg2[%12, %c0_3, %c0_4, %c0_5] : memref<1x4x16x16xf32, #tpu.memory_space<vmem>>, vector<1x4x16x16xf32>
      %14 = vector.shape_cast %13 : vector<1x4x16x16xf32> to vector<4x16x16xf32>
      %c0_i32_6 = arith.constant 0 : i32
      %c8_i32 = arith.constant 8 : i32
      %15 = arith.maxsi %8, %c0_i32_6 : i32
      %16 = arith.minsi %15, %c8_i32 : i32
      %c0_i32_7 = arith.constant 0 : i32
      %17 = arith.cmpi ne, %16, %c0_i32_7 : i32
      %18 = scf.if %17 -> (vector<4x16x16xf32>) {
        %c1_i32_14 = arith.constant 1 : i32
        %27 = arith.subi %16, %c1_i32_14 : i32
        %c0_i32_15 = arith.constant 0 : i32
        %28 = arith.cmpi ne, %27, %c0_i32_15 : i32
        %29 = scf.if %28 -> (vector<4x16x16xf32>) {
          %c1_i32_16 = arith.constant 1 : i32
          %30 = arith.subi %27, %c1_i32_16 : i32
          %c0_i32_17 = arith.constant 0 : i32
          %31 = arith.cmpi ne, %30, %c0_i32_17 : i32
          %32 = scf.if %31 -> (vector<4x16x16xf32>) {
            %c1_i32_18 = arith.constant 1 : i32
            %33 = arith.subi %30, %c1_i32_18 : i32
            %c0_i32_19 = arith.constant 0 : i32
            %34 = arith.cmpi ne, %33, %c0_i32_19 : i32
            %35 = scf.if %34 -> (vector<4x16x16xf32>) {
              %c1_i32_20 = arith.constant 1 : i32
              %36 = arith.subi %33, %c1_i32_20 : i32
              %c0_i32_21 = arith.constant 0 : i32
              %37 = arith.cmpi ne, %36, %c0_i32_21 : i32
              %38 = scf.if %37 -> (vector<4x16x16xf32>) {
                %c1_i32_22 = arith.constant 1 : i32
                %39 = arith.subi %36, %c1_i32_22 : i32
                %c0_i32_23 = arith.constant 0 : i32
                %40 = arith.cmpi ne, %39, %c0_i32_23 : i32
                %41 = scf.if %40 -> (vector<4x16x16xf32>) {
                  %c1_i32_24 = arith.constant 1 : i32
                  %42 = arith.subi %39, %c1_i32_24 : i32
                  %c0_i32_25 = arith.constant 0 : i32
                  %43 = arith.cmpi ne, %42, %c0_i32_25 : i32
                  %44 = scf.if %43 -> (vector<4x16x16xf32>) {
                    %c1_i32_26 = arith.constant 1 : i32
                    %45 = arith.subi %42, %c1_i32_26 : i32
                    %c0_i32_27 = arith.constant 0 : i32
                    %46 = arith.cmpi ne, %45, %c0_i32_27 : i32
                    %47 = scf.if %46 -> (vector<4x16x16xf32>) {
                      %c12_i32 = arith.constant 12 : i32
                      %48 = tpu.dynamic_rotate %14 by %c12_i32 dim 1 : vector<4x16x16xf32>, i32 -> vector<4x16x16xf32>
                      %49 = vector.shape_cast %1 : vector<1x16x1xi32> to vector<1x16x1xi32>
                      %50 = vector.broadcast %49 : vector<1x16x1xi32> to vector<4x16x16xi32>
                      %51 = vector.extract_strided_slice %14 {offsets = [0, 15, 0], sizes = [4, 1, 16], strides = [1, 1, 1]} : vector<4x16x16xf32> to vector<4x1x16xf32>
                      %c12_i32_28 = arith.constant 12 : i32
                      %52 = vector.broadcast %c12_i32_28 : i32 to vector<4x16x16xi32>
                      %53 = arith.cmpi sge, %50, %52 : vector<4x16x16xi32>
                      %54 = vector.shape_cast %51 : vector<4x1x16xf32> to vector<4x1x16xf32>
                      %55 = vector.broadcast %54 : vector<4x1x16xf32> to vector<4x16x16xf32>
                      %56 = arith.select %53, %55, %48 : vector<4x16x16xi1>, vector<4x16x16xf32>
                      scf.yield %56 : vector<4x16x16xf32>
                    } else {
                      %c13_i32 = arith.constant 13 : i32
                      %48 = tpu.dynamic_rotate %14 by %c13_i32 dim 1 : vector<4x16x16xf32>, i32 -> vector<4x16x16xf32>
                      %49 = vector.shape_cast %1 : vector<1x16x1xi32> to vector<1x16x1xi32>
                      %50 = vector.broadcast %49 : vector<1x16x1xi32> to vector<4x16x16xi32>
                      %51 = vector.extract_strided_slice %14 {offsets = [0, 15, 0], sizes = [4, 1, 16], strides = [1, 1, 1]} : vector<4x16x16xf32> to vector<4x1x16xf32>
                      %c13_i32_28 = arith.constant 13 : i32
                      %52 = vector.broadcast %c13_i32_28 : i32 to vector<4x16x16xi32>
                      %53 = arith.cmpi sge, %50, %52 : vector<4x16x16xi32>
                      %54 = vector.shape_cast %51 : vector<4x1x16xf32> to vector<4x1x16xf32>
                      %55 = vector.broadcast %54 : vector<4x1x16xf32> to vector<4x16x16xf32>
                      %56 = arith.select %53, %55, %48 : vector<4x16x16xi1>, vector<4x16x16xf32>
                      scf.yield %56 : vector<4x16x16xf32>
                    }
                    scf.yield %47 : vector<4x16x16xf32>
                  } else {
                    %c14_i32 = arith.constant 14 : i32
                    %45 = tpu.dynamic_rotate %14 by %c14_i32 dim 1 : vector<4x16x16xf32>, i32 -> vector<4x16x16xf32>
                    %46 = vector.shape_cast %1 : vector<1x16x1xi32> to vector<1x16x1xi32>
                    %47 = vector.broadcast %46 : vector<1x16x1xi32> to vector<4x16x16xi32>
                    %48 = vector.extract_strided_slice %14 {offsets = [0, 15, 0], sizes = [4, 1, 16], strides = [1, 1, 1]} : vector<4x16x16xf32> to vector<4x1x16xf32>
                    %c14_i32_26 = arith.constant 14 : i32
                    %49 = vector.broadcast %c14_i32_26 : i32 to vector<4x16x16xi32>
                    %50 = arith.cmpi sge, %47, %49 : vector<4x16x16xi32>
                    %51 = vector.shape_cast %48 : vector<4x1x16xf32> to vector<4x1x16xf32>
                    %52 = vector.broadcast %51 : vector<4x1x16xf32> to vector<4x16x16xf32>
                    %53 = arith.select %50, %52, %45 : vector<4x16x16xi1>, vector<4x16x16xf32>
                    scf.yield %53 : vector<4x16x16xf32>
                  }
                  scf.yield %44 : vector<4x16x16xf32>
                } else {
                  %c15_i32 = arith.constant 15 : i32
                  %42 = tpu.dynamic_rotate %14 by %c15_i32 dim 1 : vector<4x16x16xf32>, i32 -> vector<4x16x16xf32>
                  %43 = vector.shape_cast %1 : vector<1x16x1xi32> to vector<1x16x1xi32>
                  %44 = vector.broadcast %43 : vector<1x16x1xi32> to vector<4x16x16xi32>
                  %45 = vector.extract_strided_slice %14 {offsets = [0, 15, 0], sizes = [4, 1, 16], strides = [1, 1, 1]} : vector<4x16x16xf32> to vector<4x1x16xf32>
                  %c15_i32_24 = arith.constant 15 : i32
                  %46 = vector.broadcast %c15_i32_24 : i32 to vector<4x16x16xi32>
                  %47 = arith.cmpi sge, %44, %46 : vector<4x16x16xi32>
                  %48 = vector.shape_cast %45 : vector<4x1x16xf32> to vector<4x1x16xf32>
                  %49 = vector.broadcast %48 : vector<4x1x16xf32> to vector<4x16x16xf32>
                  %50 = arith.select %47, %49, %42 : vector<4x16x16xi1>, vector<4x16x16xf32>
                  scf.yield %50 : vector<4x16x16xf32>
                }
                scf.yield %41 : vector<4x16x16xf32>
              } else {
                scf.yield %14 : vector<4x16x16xf32>
              }
              scf.yield %38 : vector<4x16x16xf32>
            } else {
              %c1_i32_20 = arith.constant 1 : i32
              %36 = tpu.dynamic_rotate %14 by %c1_i32_20 dim 1 : vector<4x16x16xf32>, i32 -> vector<4x16x16xf32>
              %37 = vector.shape_cast %1 : vector<1x16x1xi32> to vector<1x16x1xi32>
              %38 = vector.broadcast %37 : vector<1x16x1xi32> to vector<4x16x16xi32>
              %39 = vector.extract_strided_slice %14 {offsets = [0, 0, 0], sizes = [4, 1, 16], strides = [1, 1, 1]} : vector<4x16x16xf32> to vector<4x1x16xf32>
              %c1_i32_21 = arith.constant 1 : i32
              %40 = vector.broadcast %c1_i32_21 : i32 to vector<4x16x16xi32>
              %41 = arith.cmpi slt, %38, %40 : vector<4x16x16xi32>
              %42 = vector.shape_cast %39 : vector<4x1x16xf32> to vector<4x1x16xf32>
              %43 = vector.broadcast %42 : vector<4x1x16xf32> to vector<4x16x16xf32>
              %44 = arith.select %41, %43, %36 : vector<4x16x16xi1>, vector<4x16x16xf32>
              scf.yield %44 : vector<4x16x16xf32>
            }
            scf.yield %35 : vector<4x16x16xf32>
          } else {
            %c2_i32_18 = arith.constant 2 : i32
            %33 = tpu.dynamic_rotate %14 by %c2_i32_18 dim 1 : vector<4x16x16xf32>, i32 -> vector<4x16x16xf32>
            %34 = vector.shape_cast %1 : vector<1x16x1xi32> to vector<1x16x1xi32>
            %35 = vector.broadcast %34 : vector<1x16x1xi32> to vector<4x16x16xi32>
            %36 = vector.extract_strided_slice %14 {offsets = [0, 0, 0], sizes = [4, 1, 16], strides = [1, 1, 1]} : vector<4x16x16xf32> to vector<4x1x16xf32>
            %c2_i32_19 = arith.constant 2 : i32
            %37 = vector.broadcast %c2_i32_19 : i32 to vector<4x16x16xi32>
            %38 = arith.cmpi slt, %35, %37 : vector<4x16x16xi32>
            %39 = vector.shape_cast %36 : vector<4x1x16xf32> to vector<4x1x16xf32>
            %40 = vector.broadcast %39 : vector<4x1x16xf32> to vector<4x16x16xf32>
            %41 = arith.select %38, %40, %33 : vector<4x16x16xi1>, vector<4x16x16xf32>
            scf.yield %41 : vector<4x16x16xf32>
          }
          scf.yield %32 : vector<4x16x16xf32>
        } else {
          %c3_i32 = arith.constant 3 : i32
          %30 = tpu.dynamic_rotate %14 by %c3_i32 dim 1 : vector<4x16x16xf32>, i32 -> vector<4x16x16xf32>
          %31 = vector.shape_cast %1 : vector<1x16x1xi32> to vector<1x16x1xi32>
          %32 = vector.broadcast %31 : vector<1x16x1xi32> to vector<4x16x16xi32>
          %33 = vector.extract_strided_slice %14 {offsets = [0, 0, 0], sizes = [4, 1, 16], strides = [1, 1, 1]} : vector<4x16x16xf32> to vector<4x1x16xf32>
          %c3_i32_16 = arith.constant 3 : i32
          %34 = vector.broadcast %c3_i32_16 : i32 to vector<4x16x16xi32>
          %35 = arith.cmpi slt, %32, %34 : vector<4x16x16xi32>
          %36 = vector.shape_cast %33 : vector<4x1x16xf32> to vector<4x1x16xf32>
          %37 = vector.broadcast %36 : vector<4x1x16xf32> to vector<4x16x16xf32>
          %38 = arith.select %35, %37, %30 : vector<4x16x16xi1>, vector<4x16x16xf32>
          scf.yield %38 : vector<4x16x16xf32>
        }
        scf.yield %29 : vector<4x16x16xf32>
      } else {
        %c4_i32 = arith.constant 4 : i32
        %27 = tpu.dynamic_rotate %14 by %c4_i32 dim 1 : vector<4x16x16xf32>, i32 -> vector<4x16x16xf32>
        %28 = vector.shape_cast %1 : vector<1x16x1xi32> to vector<1x16x1xi32>
        %29 = vector.broadcast %28 : vector<1x16x1xi32> to vector<4x16x16xi32>
        %30 = vector.extract_strided_slice %14 {offsets = [0, 0, 0], sizes = [4, 1, 16], strides = [1, 1, 1]} : vector<4x16x16xf32> to vector<4x1x16xf32>
        %c4_i32_14 = arith.constant 4 : i32
        %31 = vector.broadcast %c4_i32_14 : i32 to vector<4x16x16xi32>
        %32 = arith.cmpi slt, %29, %31 : vector<4x16x16xi32>
        %33 = vector.shape_cast %30 : vector<4x1x16xf32> to vector<4x1x16xf32>
        %34 = vector.broadcast %33 : vector<4x1x16xf32> to vector<4x16x16xf32>
        %35 = arith.select %32, %34, %27 : vector<4x16x16xi1>, vector<4x16x16xf32>
        scf.yield %35 : vector<4x16x16xf32>
      }
      %c0_i32_8 = arith.constant 0 : i32
      %c8_i32_9 = arith.constant 8 : i32
      %19 = arith.maxsi %6, %c0_i32_8 : i32
      %20 = arith.minsi %19, %c8_i32_9 : i32
      %c0_i32_10 = arith.constant 0 : i32
      %21 = arith.cmpi ne, %20, %c0_i32_10 : i32
      %22 = scf.if %21 -> (vector<4x16x16xf32>) {
        %c1_i32_14 = arith.constant 1 : i32
        %27 = arith.subi %20, %c1_i32_14 : i32
        %c0_i32_15 = arith.constant 0 : i32
        %28 = arith.cmpi ne, %27, %c0_i32_15 : i32
        %29 = scf.if %28 -> (vector<4x16x16xf32>) {
          %c1_i32_16 = arith.constant 1 : i32
          %30 = arith.subi %27, %c1_i32_16 : i32
          %c0_i32_17 = arith.constant 0 : i32
          %31 = arith.cmpi ne, %30, %c0_i32_17 : i32
          %32 = scf.if %31 -> (vector<4x16x16xf32>) {
            %c1_i32_18 = arith.constant 1 : i32
            %33 = arith.subi %30, %c1_i32_18 : i32
            %c0_i32_19 = arith.constant 0 : i32
            %34 = arith.cmpi ne, %33, %c0_i32_19 : i32
            %35 = scf.if %34 -> (vector<4x16x16xf32>) {
              %c1_i32_20 = arith.constant 1 : i32
              %36 = arith.subi %33, %c1_i32_20 : i32
              %c0_i32_21 = arith.constant 0 : i32
              %37 = arith.cmpi ne, %36, %c0_i32_21 : i32
              %38 = scf.if %37 -> (vector<4x16x16xf32>) {
                %c1_i32_22 = arith.constant 1 : i32
                %39 = arith.subi %36, %c1_i32_22 : i32
                %c0_i32_23 = arith.constant 0 : i32
                %40 = arith.cmpi ne, %39, %c0_i32_23 : i32
                %41 = scf.if %40 -> (vector<4x16x16xf32>) {
                  %c1_i32_24 = arith.constant 1 : i32
                  %42 = arith.subi %39, %c1_i32_24 : i32
                  %c0_i32_25 = arith.constant 0 : i32
                  %43 = arith.cmpi ne, %42, %c0_i32_25 : i32
                  %44 = scf.if %43 -> (vector<4x16x16xf32>) {
                    %c1_i32_26 = arith.constant 1 : i32
                    %45 = arith.subi %42, %c1_i32_26 : i32
                    %c0_i32_27 = arith.constant 0 : i32
                    %46 = arith.cmpi ne, %45, %c0_i32_27 : i32
                    %47 = scf.if %46 -> (vector<4x16x16xf32>) {
                      %c12_i32 = arith.constant 12 : i32
                      %48 = tpu.dynamic_rotate %18 by %c12_i32 dim 2 : vector<4x16x16xf32>, i32 -> vector<4x16x16xf32>
                      %49 = vector.shape_cast %2 : vector<1x1x16xi32> to vector<1x1x16xi32>
                      %50 = vector.broadcast %49 : vector<1x1x16xi32> to vector<4x16x16xi32>
                      %51 = vector.extract_strided_slice %18 {offsets = [0, 0, 15], sizes = [4, 16, 1], strides = [1, 1, 1]} : vector<4x16x16xf32> to vector<4x16x1xf32>
                      %c12_i32_28 = arith.constant 12 : i32
                      %52 = vector.broadcast %c12_i32_28 : i32 to vector<4x16x16xi32>
                      %53 = arith.cmpi sge, %50, %52 : vector<4x16x16xi32>
                      %54 = vector.shape_cast %51 : vector<4x16x1xf32> to vector<4x16x1xf32>
                      %55 = vector.broadcast %54 : vector<4x16x1xf32> to vector<4x16x16xf32>
                      %56 = arith.select %53, %55, %48 : vector<4x16x16xi1>, vector<4x16x16xf32>
                      scf.yield %56 : vector<4x16x16xf32>
                    } else {
                      %c13_i32 = arith.constant 13 : i32
                      %48 = tpu.dynamic_rotate %18 by %c13_i32 dim 2 : vector<4x16x16xf32>, i32 -> vector<4x16x16xf32>
                      %49 = vector.shape_cast %2 : vector<1x1x16xi32> to vector<1x1x16xi32>
                      %50 = vector.broadcast %49 : vector<1x1x16xi32> to vector<4x16x16xi32>
                      %51 = vector.extract_strided_slice %18 {offsets = [0, 0, 15], sizes = [4, 16, 1], strides = [1, 1, 1]} : vector<4x16x16xf32> to vector<4x16x1xf32>
                      %c13_i32_28 = arith.constant 13 : i32
                      %52 = vector.broadcast %c13_i32_28 : i32 to vector<4x16x16xi32>
                      %53 = arith.cmpi sge, %50, %52 : vector<4x16x16xi32>
                      %54 = vector.shape_cast %51 : vector<4x16x1xf32> to vector<4x16x1xf32>
                      %55 = vector.broadcast %54 : vector<4x16x1xf32> to vector<4x16x16xf32>
                      %56 = arith.select %53, %55, %48 : vector<4x16x16xi1>, vector<4x16x16xf32>
                      scf.yield %56 : vector<4x16x16xf32>
                    }
                    scf.yield %47 : vector<4x16x16xf32>
                  } else {
                    %c14_i32 = arith.constant 14 : i32
                    %45 = tpu.dynamic_rotate %18 by %c14_i32 dim 2 : vector<4x16x16xf32>, i32 -> vector<4x16x16xf32>
                    %46 = vector.shape_cast %2 : vector<1x1x16xi32> to vector<1x1x16xi32>
                    %47 = vector.broadcast %46 : vector<1x1x16xi32> to vector<4x16x16xi32>
                    %48 = vector.extract_strided_slice %18 {offsets = [0, 0, 15], sizes = [4, 16, 1], strides = [1, 1, 1]} : vector<4x16x16xf32> to vector<4x16x1xf32>
                    %c14_i32_26 = arith.constant 14 : i32
                    %49 = vector.broadcast %c14_i32_26 : i32 to vector<4x16x16xi32>
                    %50 = arith.cmpi sge, %47, %49 : vector<4x16x16xi32>
                    %51 = vector.shape_cast %48 : vector<4x16x1xf32> to vector<4x16x1xf32>
                    %52 = vector.broadcast %51 : vector<4x16x1xf32> to vector<4x16x16xf32>
                    %53 = arith.select %50, %52, %45 : vector<4x16x16xi1>, vector<4x16x16xf32>
                    scf.yield %53 : vector<4x16x16xf32>
                  }
                  scf.yield %44 : vector<4x16x16xf32>
                } else {
                  %c15_i32 = arith.constant 15 : i32
                  %42 = tpu.dynamic_rotate %18 by %c15_i32 dim 2 : vector<4x16x16xf32>, i32 -> vector<4x16x16xf32>
                  %43 = vector.shape_cast %2 : vector<1x1x16xi32> to vector<1x1x16xi32>
                  %44 = vector.broadcast %43 : vector<1x1x16xi32> to vector<4x16x16xi32>
                  %45 = vector.extract_strided_slice %18 {offsets = [0, 0, 15], sizes = [4, 16, 1], strides = [1, 1, 1]} : vector<4x16x16xf32> to vector<4x16x1xf32>
                  %c15_i32_24 = arith.constant 15 : i32
                  %46 = vector.broadcast %c15_i32_24 : i32 to vector<4x16x16xi32>
                  %47 = arith.cmpi sge, %44, %46 : vector<4x16x16xi32>
                  %48 = vector.shape_cast %45 : vector<4x16x1xf32> to vector<4x16x1xf32>
                  %49 = vector.broadcast %48 : vector<4x16x1xf32> to vector<4x16x16xf32>
                  %50 = arith.select %47, %49, %42 : vector<4x16x16xi1>, vector<4x16x16xf32>
                  scf.yield %50 : vector<4x16x16xf32>
                }
                scf.yield %41 : vector<4x16x16xf32>
              } else {
                scf.yield %18 : vector<4x16x16xf32>
              }
              scf.yield %38 : vector<4x16x16xf32>
            } else {
              %c1_i32_20 = arith.constant 1 : i32
              %36 = tpu.dynamic_rotate %18 by %c1_i32_20 dim 2 : vector<4x16x16xf32>, i32 -> vector<4x16x16xf32>
              %37 = vector.shape_cast %2 : vector<1x1x16xi32> to vector<1x1x16xi32>
              %38 = vector.broadcast %37 : vector<1x1x16xi32> to vector<4x16x16xi32>
              %39 = vector.extract_strided_slice %18 {offsets = [0, 0, 0], sizes = [4, 16, 1], strides = [1, 1, 1]} : vector<4x16x16xf32> to vector<4x16x1xf32>
              %c1_i32_21 = arith.constant 1 : i32
              %40 = vector.broadcast %c1_i32_21 : i32 to vector<4x16x16xi32>
              %41 = arith.cmpi slt, %38, %40 : vector<4x16x16xi32>
              %42 = vector.shape_cast %39 : vector<4x16x1xf32> to vector<4x16x1xf32>
              %43 = vector.broadcast %42 : vector<4x16x1xf32> to vector<4x16x16xf32>
              %44 = arith.select %41, %43, %36 : vector<4x16x16xi1>, vector<4x16x16xf32>
              scf.yield %44 : vector<4x16x16xf32>
            }
            scf.yield %35 : vector<4x16x16xf32>
          } else {
            %c2_i32_18 = arith.constant 2 : i32
            %33 = tpu.dynamic_rotate %18 by %c2_i32_18 dim 2 : vector<4x16x16xf32>, i32 -> vector<4x16x16xf32>
            %34 = vector.shape_cast %2 : vector<1x1x16xi32> to vector<1x1x16xi32>
            %35 = vector.broadcast %34 : vector<1x1x16xi32> to vector<4x16x16xi32>
            %36 = vector.extract_strided_slice %18 {offsets = [0, 0, 0], sizes = [4, 16, 1], strides = [1, 1, 1]} : vector<4x16x16xf32> to vector<4x16x1xf32>
            %c2_i32_19 = arith.constant 2 : i32
            %37 = vector.broadcast %c2_i32_19 : i32 to vector<4x16x16xi32>
            %38 = arith.cmpi slt, %35, %37 : vector<4x16x16xi32>
            %39 = vector.shape_cast %36 : vector<4x16x1xf32> to vector<4x16x1xf32>
            %40 = vector.broadcast %39 : vector<4x16x1xf32> to vector<4x16x16xf32>
            %41 = arith.select %38, %40, %33 : vector<4x16x16xi1>, vector<4x16x16xf32>
            scf.yield %41 : vector<4x16x16xf32>
          }
          scf.yield %32 : vector<4x16x16xf32>
        } else {
          %c3_i32 = arith.constant 3 : i32
          %30 = tpu.dynamic_rotate %18 by %c3_i32 dim 2 : vector<4x16x16xf32>, i32 -> vector<4x16x16xf32>
          %31 = vector.shape_cast %2 : vector<1x1x16xi32> to vector<1x1x16xi32>
          %32 = vector.broadcast %31 : vector<1x1x16xi32> to vector<4x16x16xi32>
          %33 = vector.extract_strided_slice %18 {offsets = [0, 0, 0], sizes = [4, 16, 1], strides = [1, 1, 1]} : vector<4x16x16xf32> to vector<4x16x1xf32>
          %c3_i32_16 = arith.constant 3 : i32
          %34 = vector.broadcast %c3_i32_16 : i32 to vector<4x16x16xi32>
          %35 = arith.cmpi slt, %32, %34 : vector<4x16x16xi32>
          %36 = vector.shape_cast %33 : vector<4x16x1xf32> to vector<4x16x1xf32>
          %37 = vector.broadcast %36 : vector<4x16x1xf32> to vector<4x16x16xf32>
          %38 = arith.select %35, %37, %30 : vector<4x16x16xi1>, vector<4x16x16xf32>
          scf.yield %38 : vector<4x16x16xf32>
        }
        scf.yield %29 : vector<4x16x16xf32>
      } else {
        %c4_i32 = arith.constant 4 : i32
        %27 = tpu.dynamic_rotate %18 by %c4_i32 dim 2 : vector<4x16x16xf32>, i32 -> vector<4x16x16xf32>
        %28 = vector.shape_cast %2 : vector<1x1x16xi32> to vector<1x1x16xi32>
        %29 = vector.broadcast %28 : vector<1x1x16xi32> to vector<4x16x16xi32>
        %30 = vector.extract_strided_slice %18 {offsets = [0, 0, 0], sizes = [4, 16, 1], strides = [1, 1, 1]} : vector<4x16x16xf32> to vector<4x16x1xf32>
        %c4_i32_14 = arith.constant 4 : i32
        %31 = vector.broadcast %c4_i32_14 : i32 to vector<4x16x16xi32>
        %32 = arith.cmpi slt, %29, %31 : vector<4x16x16xi32>
        %33 = vector.shape_cast %30 : vector<4x16x1xf32> to vector<4x16x1xf32>
        %34 = vector.broadcast %33 : vector<4x16x1xf32> to vector<4x16x16xf32>
        %35 = arith.select %32, %34, %27 : vector<4x16x16xi1>, vector<4x16x16xf32>
        scf.yield %35 : vector<4x16x16xf32>
      }
      %23 = arith.index_cast %c0_i32 : i32 to index
      %c0_11 = arith.constant 0 : index
      %c0_12 = arith.constant 0 : index
      %c0_13 = arith.constant 0 : index
      %24 = vector.load %arg3[%23, %c0_11, %c0_12, %c0_13] : memref<1x4x16x16xf32, #tpu.memory_space<vmem>>, vector<1x4x16x16xf32>
      %25 = vector.shape_cast %24 : vector<1x4x16x16xf32> to vector<4x16x16xf32>
      %26 = vector.shape_cast %22 : vector<4x16x16xf32> to vector<1x4x16x16xf32>
      tpu.vector_store %arg3[%23, %c0_11, %c0_12, %c0_13], %26 {strides = array<i32>} : memref<1x4x16x16xf32, #tpu.memory_space<vmem>>, vector<1x4x16x16xf32>,
    } else {
    }
    %c1_i32_2 = arith.constant 1 : i32
    return
  }
  func.func @transform_0(%arg0: i32, %arg1: memref<2x2xi32, #tpu.memory_space<smem>>) -> (i32, i32, i32, i32) {
    %c0_i32 = arith.constant 0 : i32
    %c0_i32_0 = arith.constant 0 : i32
    %c0_i32_1 = arith.constant 0 : i32
    %c0_i32_2 = arith.constant 0 : i32
    return %arg0, %c0_i32, %c0_i32_0, %c0_i32_1 : i32, i32, i32, i32
  }
  func.func @transform_1(%arg0: i32, %arg1: memref<2x2xi32, #tpu.memory_space<smem>>) -> (i32, i32, i32, i32) {
    %c0_i32 = arith.constant 0 : i32
    %c0_i32_0 = arith.constant 0 : i32
    %c0_i32_1 = arith.constant 0 : i32
    %c0_i32_2 = arith.constant 0 : i32
    return %arg0, %c0_i32, %c0_i32_0, %c0_i32_1 : i32, i32, i32, i32
  }
}

</mosaic_0001>

<bundles_post_ra>
// kernel: tpu_custom_call.1
= control target key start
LH: loop header
LB: loop body
LE: loop exit
PB: predicated region body
PF: predicated region fallthrough
CT: control target
= control target key end

     0   :  { %s7634_s0 = inlined_call_operand.hbm [shape: s32[2,2], index: 0, kind: input, shape index: {}]   ;;  %s7635_s1 = inlined_call_operand.hbm [shape: f32[2,4,16,16], index: 1, kind: input, shape index: {}]   ;;  %s7636_s2 = inlined_call_operand.hbm [shape: f32[2,4,16,16], index: 2, kind: output, shape index: {}]  }
   0x1   :  { %s3930_s11 = scalar_lea.hbm %s7634_s0, 32 }
   0x2   :  { %p3931_p0 = scmp.ne.s32.totalorder %s7634_s0, %s3930_s11  ;;  %p3934_p1 = scmp.lt.u32.totalorder %s3930_s11, %s7634_s0 }
   0x4   :  { %p3936_p2 = pnand %p3934_p1, %p3931_p0 }
   0x6   :  { %3939 = shalt.err (!%p3936_p2)  }
   0x7   :  { %s5448_s16 = smov [#allocation3]  }
   0x8   :  { %8 = dma.hbm_to_smem %s7634_s0, 32, %s5448_s16, [#allocation2] }
   0x9   :  { %4718 = dma.done.wait [#allocation2], 32 }
   0xa   :  { %4719 = vsyncadd [#allocation2], 4294967264 }
   0xb   :  { %10 = sfence }
   0xc   :  { %11 = vsyncpa [#allocation5], 0 }
   0xd   :  { %13 = vsyncpa [#allocation5 + $0x1], 0 }
   0xe   :  { %14 = vsyncpa [#allocation6], 0 }
   0xf   :  { %16 = vsyncpa [#allocation6 + $0x1], 0  ;;  %s5506_s19 = smov 0   ;;  %s5508_s20 = smov 0  }
  0x10   :  { %s5510_s21 = smov 0   ;;  %s5512_s22 = smov 0  }
  0x11 LB: > { %s5527_s0 = sadd.s32 4294967295, %s4742_s22   ;;  %s2029_s23 = sadd.s32 4294967294, %s4742_s22   ;;  %s4742_s22 = sphi %s5512_s22, %s7725_s22   ;;  %s4738_s21 = sphi %s5510_s21, %s7724_s21   ;;  %s4734_s20 = sphi %s5508_s20, %s7723_s20   ;;  %s4730_s19 = sphi %s5506_s19, %s7722_s19  }
  0x12   : > { %s5531_s24 = sadd.s32 1, %s4742_s22   ;;  %s29_s25 = sadd.s32 1, %s4738_s21 }
  0x13   : > { %s26_s26 = ssub.s32 %s4742_s22, %s5531_s24  ;;  %p36_p3 = scmp.ne.s32.totalorder %s4738_s21, %s4734_s20 }
  0x14   : > { %p27_p4 = scmp.eq.s32.totalorder %s26_s26, 0  ;;  %p37_p5 = scmp.eq.s32.totalorder %s4742_s22, 0 }
  0x15   : > { %p42_p6 = scmp.ne.s32.totalorder %s4734_s20, %s4730_s19  ;;  %p43_p7 = scmp.eq.s32.totalorder %s5527_s0, 0 }
  0x16   : > { %s5543_s27 = scalar_select %p27_p4, %s4738_s21, %s29_s25  }
  0x17   : > { %p5545_p8 = por %p37_p5, %p36_p3  ;;  %p5549_p9 = por %p43_p7, %p42_p6 }
  0x18   : > { %p66_p10 = scmp.eq.s32.totalorder %s5527_s0, 1  ;;  %p72_p11 = scmp.eq.s32.totalorder %s2029_s23, 1 }
  0x19   : > { %p2433_p13 = scmp.lt.s32.totalorder %s4742_s22, 2  ;;  %s92_s4 = sand.u32 1, %s4738_s21  }
  0x1a   : > { %p5556_p0 = por %p66_p10, %p36_p3  ;;  %p5560_p1 = por %p72_p11, %p42_p6 }
  0x1b   : > { %s2085_s5 = sshll.u32 %s4742_s22, 10  ;;  %s2032_s6 = sshll.u32 %s92_s4, 6 }
  0x1c   : > { %s7640_s30 = scalar_select %p5556_p0, 1, 0 }
  0x1d   : > { %s7641_s3 = scalar_select %p5560_p1, 1, 0 }
  0x1e   : > { %s5569_s9 = scalar_lea.hbm %s7635_s1, %s2085_s5  ;;  %s96_s10 = scalar_lea.vmem [#allocation4], %s2032_s6 }
  0x1f   : > { %s103_s11 = sshll.u32 %s96_s10, 4  ;;  %p5573_p2 = pnand %p2433_p13, %p5545_p8  ;;  %s5577_s11 = int_to_ptr.vmem [resolvable:$true] %s103_s11 }
  0x20   : > { %s5579_s13 = scalar_lea.sflag [#allocation5], %s92_s4  ;;  %s3940_s14 = scalar_lea.hbm %s5569_s9, 1024 }
  0x21   : > { %p3941_p3 = scmp.ne.s32.totalorder %s5569_s9, %s3940_s14  ;;  %p3942_p4 = pneg %p5573_p2 }
  0x22   : > { %s3945_s17 = scalar_lea.hbm %s7635_s1, 2048  ;;  %p3946_p7 = scmp.lt.u32.totalorder %s5569_s9, %s7635_s1 }
  0x23   : > { %p3943_p5 = pnand %p3942_p4, %p3941_p3  ;;  %p3947_p8 = scmp.lt.u32.totalorder %s3945_s17, %s3940_s14 }
  0x24   : > { %p3949_p11 = scmp.lt.u32.totalorder %s3940_s14, %s5569_s9 }
  0x25   : > { %p3944_p6 = pneg %p3943_p5  ;;  %p3948_p10 = por %p3947_p8, %p3946_p7 }
  0x27   : > { %p3950_p13 = por %p3949_p11, %p3948_p10 }
  0x29   : > { %p3951_p12 = pnand %p3950_p13, %p3944_p6 }
  0x2b   : > { %3954 = shalt.err (!%p3951_p12)
}
  0x2c   : > { %s3955_s25 = scalar_lea.vmem %s5577_s11, 1024  ;;  %s5449_s26 = smov [#allocation4]  }
  0x2d   : > { %p3956_p3 = scmp.ne.s32.totalorder %s5577_s11, %s3955_s25  ;;  %s3960_s28 = sshll.u32 %s5449_s26, 4  ;;  %s3961_s28 = int_to_ptr.vmem [resolvable:$false] %s3960_s28 }
  0x2e   : > { %s3962_s4 = scalar_lea.vmem %s3961_s28, 2048  ;;  %p3963_p0 = scmp.lt.s32.totalorder %s5577_s11, %s3961_s28 }
  0x2f   : > { %p3958_p5 = pnand %p3956_p3, %p3942_p4  ;;  %p3964_p7 = scmp.lt.s32.totalorder %s3962_s4, %s3955_s25 }
  0x31   : > { %p3959_p1 = pneg %p3958_p5  ;;  %p3965_p8 = por %p3964_p7, %p3963_p0 }
  0x33   : > { %p3966_p10 = pnand %p3965_p8, %p3959_p1 }
  0x35   : > { %3969 = shalt.err (!%p3966_p10)
}
  0x36   : > { %s5450_s5 = smov 128   ;;  %s5451_s6 = smov 8  }
  0x37   : > { %2428 = dma.hbm_to_vmem [thread:$0]  (!%p5573_p2), %s5569_s9, 1024, %s5577_s11, %s5579_s13, %s5450_s5, %s5450_s5, %s5451_s6  }
  0x38   : > { %p2035_p12 = scmp.ge.s32.totalorder %s4742_s22, 1  ;;  %p111_p4 = scmp.lt.s32.totalorder %s4742_s22, 3 }
  0x3a   : > { %p112_p6 = pnand %p2035_p12, %p111_p4 }
  0x3b   : > { %s5610_s7 = sand.u32 (!%p112_p6), 1, %s4734_s20  }
  0x3c   : > { %115 = sbr.rel (%p112_p6) target bundleno = 3229 (0xc9d), region = 24  ;;  %s2036_s8 = sshll.u32 (!%p112_p6), %s5610_s7, 6 }
  0x3d   : > { %s118_s10 = scalar_lea.sflag (!%p112_p6), [#allocation5], %s5610_s7  ;;  %s121_s14 = scalar_lea.vmem (!%p112_p6), [#allocation4], %s2036_s8 }
  0x43   : > { %4721 = dma.done.wait (%p5549_p9), %s118_s10, 1024  }
  0x44   : > { %4723 = vsyncadd (%p5549_p9), %s118_s10, 4294966272  ;;  %p145_p0 = scmp.lt.s32.totalorder %s5527_s0, 1  ;;  %v140_v0 = vlaneseq  ;;  %s5629_s16 = scalar_lea.vmem [#allocation7], %s2036_s8 }
  0x45   : > { %p2039_p9 = scmp.ge.s32.totalorder %s5527_s0, 2 }
  0x46   : > { %s146_s9 = scalar_select %p145_p0, %s5527_s0, 1  ;;  %v5620_v1 = vshrl.u32 %v140_v0, 7  ;;  %v5622_v2 = vand.u32 127, %v140_v0 }
  0x47   : > { %154 = sbr.rel (%p2039_p9) target bundleno = 3203 (0xc83), region = 32  ;;  %v5632_v4 = vld [vmem:[%s121_s14] sm:$0xff] (!%p2039_p9)  ;;  %v5634_v5 = vld [vmem:[%s121_s14 + $0x8] sm:$0xff] (!%p2039_p9)  ;;  %v5636_v6 = vld [vmem:[%s121_s14 + $0x10] sm:$0xff] (!%p2039_p9)  ;;  %v5651_v12 = vmov (!%p2039_p9), 0   ;;  %v5653_v13 = vmov (!%p2039_p9), 0  }
  0x48   : > { %s2038_s11 = sshll.u32 %s146_s9, 7  ;;  %v5625_v3 = vadd.s32 8, %v5620_v1  ;;  %v5638_v7 = vld [vmem:[%s121_s14 + $0x18] sm:$0xff] (!%p2039_p9)  ;;  %v5640_v8 = vld [vmem:[%s121_s14 + $0x20] sm:$0xff] (!%p2039_p9)  ;;  %v5642_v9 = vld [vmem:[%s121_s14 + $0x28] sm:$0xff] (!%p2039_p9)  ;;  %v5655_v14 = vmov (!%p2039_p9), 0  }
  0x49   : > { %s5627_s12 = sld [smem:[#allocation3 + %s2038_s11]]  ;;  %s149_s13 = sadd.s32 1, %s2038_s11  ;;  %v5644_v10 = vld [vmem:[%s121_s14 + $0x30] sm:$0xff] (!%p2039_p9)  ;;  %v5646_v11 = vld [vmem:[%s121_s14 + $0x38] sm:$0xff] (!%p2039_p9)  ;;  %v5657_v15 = vmov (!%p2039_p9), 0   ;;  %v5659_v16 = vmov (!%p2039_p9), 0  }
  0x4a   : > { %s150_s15 = sld [smem:[#allocation3 + %s149_s13]]  ;;  %v5661_v17 = vmov (!%p2039_p9), 0   ;;  %v5663_v18 = vmov (!%p2039_p9), 0   ;;  %v5665_v19 = vmov (!%p2039_p9), 0  }
  0x50   : > { %p163_p1 = scmp.gt.s32.totalorder %s150_s15, 0  ;;  %p2040_p2 = scmp.lt.s32.totalorder %s150_s15, 8 }
  0x52   : > { %s7727_s15 = smov (!%p163_p1, %s150_s15), 0 }
  0x53   : > { %s7729_s15 = smov (!%p2040_p2, %s7727_s15), 8 }
  0x54   : > { %p2045_p11 = scmp.eq.s32.totalorder %s7729_s15, 0 }
  0x55   : > { %s2046_s29 = sadd.s32 (!%p2045_p11), 4294967295, %s7729_s15  ;;  %v5674_v20 = vmov (!%p2045_p11), 0   ;;  %v5676_v21 = vmov (!%p2045_p11), 0   ;;  %v5678_v22 = vmov (!%p2045_p11), 0   ;;  %v5680_v23 = vmov (!%p2045_p11), 0  }
  0x56   : > { %170 = sbr.rel (%p2045_p11) target bundleno = 203 (0xcb), region = 36  ;;  %p5670_p13 = scmp.eq.s32.totalorder (!%p2045_p11), %s2046_s29, 0  ;;  %v5682_v24 = vmov (!%p2045_p11), 0   ;;  %v5684_v25 = vmov (!%p2045_p11), 0   ;;  %v5686_v26 = vmov (!%p2045_p11), 0   ;;  %v5688_v27 = vmov (!%p2045_p11), 0  }
  0x5d   : > { %175 = sbr.rel (%p5670_p13) target bundleno = 193 (0xc1), region = 40  ;;  %s2048_s18 = sadd.s32 (!%p5670_p13), 4294967294, %s7729_s15  ;;  %v5697_v28 = vmov (!%p5670_p13), 0   ;;  %v5699_v29 = vmov (!%p5670_p13), 0   ;;  %v5701_v30 = vmov (!%p5670_p13), 0   ;;  %v5703_v31 = vmov (!%p5670_p13), 0  }
  0x5e   : > { %p5693_p3 = scmp.eq.s32.totalorder (!%p5670_p13), %s2048_s18, 0  ;;  %v5705_v32 = vmov (!%p5670_p13), 0   ;;  %v5707_v33 = vmov (!%p5670_p13), 0   ;;  %v5709_v34 = vmov (!%p5670_p13), 0   ;;  %v5711_v35 = vmov (!%p5670_p13), 0  }
  0x64   : > { %180 = sbr.rel (%p5693_p3) target bundleno = 183 (0xb7), region = 44  ;;  %s2050_s25 = sadd.s32 (!%p5693_p3), 4294967293, %s7729_s15  ;;  %v5720_v36 = vmov (!%p5693_p3), 0   ;;  %v5722_v37 = vmov (!%p5693_p3), 0   ;;  %v5724_v38 = vmov (!%p5693_p3), 0   ;;  %v5726_v39 = vmov (!%p5693_p3), 0  }
  0x65   : > { %p5716_p5 = scmp.eq.s32.totalorder (!%p5693_p3), %s2050_s25, 0  ;;  %v5728_v40 = vmov (!%p5693_p3), 0   ;;  %v5730_v41 = vmov (!%p5693_p3), 0   ;;  %v5732_v42 = vmov (!%p5693_p3), 0   ;;  %v5734_v43 = vmov (!%p5693_p3), 0  }
  0x6b   : > { %185 = sbr.rel (%p5716_p5) target bundleno = 173 (0xad), region = 48  ;;  %s2052_s28 = sadd.s32 (!%p5716_p5), 4294967292, %s7729_s15  ;;  %v5743_v44 = vmov (!%p5716_p5), 0   ;;  %v5745_v45 = vmov (!%p5716_p5), 0   ;;  %v5747_v46 = vmov (!%p5716_p5), 0   ;;  %v5749_v47 = vmov (!%p5716_p5), 0  }
  0x6c   : > { %p5739_p7 = scmp.eq.s32.totalorder (!%p5716_p5), %s2052_s28, 0  ;;  %v5751_v48 = vmov (!%p5716_p5), 0   ;;  %v5753_v49 = vmov (!%p5716_p5), 0   ;;  %v5755_v50 = vmov (!%p5716_p5), 0   ;;  %v5757_v51 = vmov (!%p5716_p5), 0  }
  0x72   : > { %190 = sbr.rel (%p5739_p7) target bundleno = 167 (0xa7), region = 52  ;;  %s2054_s5 = sadd.s32 (!%p5739_p7), 4294967291, %s7729_s15  ;;  %v5766_v52 = vmov (!%p5739_p7), 0   ;;  %v5768_v53 = vmov (!%p5739_p7), 0   ;;  %v5770_v54 = vmov (!%p5739_p7), 0   ;;  %v5772_v55 = vmov (!%p5739_p7), 0  }
  0x73   : > { %p5762_p8 = scmp.eq.s32.totalorder (!%p5739_p7), %s2054_s5, 0  ;;  %v5774_v56 = vmov (!%p5739_p7), 0   ;;  %v5776_v57 = vmov (!%p5739_p7), 0   ;;  %v5778_v58 = vmov (!%p5739_p7), 0   ;;  %v5780_v59 = vmov (!%p5739_p7), 0  }
  0x79   : > { %195 = sbr.rel (%p5762_p8) target bundleno = 157 (0x9d), region = 56  ;;  %s2056_s8 = sadd.s32 (!%p5762_p8), 4294967290, %s7729_s15  ;;  %v5789_v60 = vmov (!%p5762_p8), 0   ;;  %v5791_v61 = vmov (!%p5762_p8), 0   ;;  %v5793_v62 = vmov (!%p5762_p8), 0   ;;  %v5795_v63 = vmov (!%p5762_p8), 0  }
  0x7a   : > { %p5785_p10 = scmp.eq.s32.totalorder (!%p5762_p8), %s2056_s8, 0  ;;  %v5797_v0 = vmov (!%p5762_p8), 0   ;;  %v5799_v12 = vmov (!%p5762_p8), 0   ;;  %v5801_v13 = vmov (!%p5762_p8), 0   ;;  %v5803_v14 = vmov (!%p5762_p8), 0  }
  0x80   : > { %200 = sbr.rel (%p5785_p10) target bundleno = 147 (0x93), region = 60  ;;  %s2058_s14 = sadd.s32 (!%p5785_p10), 4294967289, %s7729_s15  ;;  %v206_v15 = vrot.slane (!%p5785_p10), %v5632_v4, 4  ;;  %v207_v16 = vrot.slane (!%p5785_p10), %v5636_v6, 4  ;;  %v208_v17 = vrot.slane (!%p5785_p10), %v5640_v8, 4  ;;  %v209_v18 = vrot.slane (!%p5785_p10), %v5644_v10, 4 }
  0x81   : > { %p5812_p12 = scmp.ne.s32.totalorder (!%p5785_p10), %s2058_s14, 0  ;;  %v210_v19 = vrot.slane (!%p5785_p10), %v5634_v5, 4  ;;  %v211_v20 = vrot.slane (!%p5785_p10), %v5638_v7, 4  ;;  %v212_v21 = vrot.slane (!%p5785_p10), %v5642_v9, 4  ;;  %v213_v22 = vrot.slane (!%p5785_p10), %v5646_v11, 4  ;;  %p5820_p4 = scmp.eq.s32.totalorder (!%p5785_p10), %s2058_s14, 0 }
  0x82   : > { %vm214_vm0 = vcmp.lt.s32.totalorder (!%p5785_p10), %v5620_v1, 4  ;;  %vm224_vm1 = vcmp.ge.s32.totalorder (!%p5785_p10), %v5625_v3, 12  ;;  %v227_v23 = vsub.s32 (!%p5785_p10), 7, %v5620_v1  ;;  %v260_v24 = vrot.slane (!%p5785_p10), %v5632_v4, 3 }
  0x83   : > { %v215_v25 = vsel (!%p5785_p10), %vm214_vm0, %v206_v15, %v210_v19  ;;  %v216_v26 = vsel (!%p5785_p10), %vm214_vm0, %v207_v16, %v211_v20  ;;  %v217_v27 = vsel (!%p5785_p10), %vm214_vm0, %v208_v17, %v212_v21  ;;  %v218_v28 = vsel (!%p5785_p10), %vm214_vm0, %v209_v18, %v213_v22 }
  0x84   : > { %v219_v29 = vsel (!%p5785_p10), %vm214_vm0, %v210_v19, %v206_v15  ;;  %v220_v30 = vsel (!%p5785_p10), %vm214_vm0, %v211_v20, %v207_v16  ;;  %v221_v31 = vsel (!%p5785_p10), %vm214_vm0, %v212_v21, %v208_v17  ;;  %v222_v32 = vsel (!%p5785_p10), %vm214_vm0, %v213_v22, %v209_v18 }
  0x85   : > { %v228_v33 = vrot.slane (!%p5785_p10), %v5634_v5, %v227_v23  ;;  %v232_v34 = vrot.slane (!%p5785_p10), %v5638_v7, %v227_v23  ;;  %v236_v35 = vrot.slane (!%p5785_p10), %v5642_v9, %v227_v23  ;;  %v240_v36 = vrot.slane (!%p5785_p10), %v5646_v11, %v227_v23 }
  0x86   : > { %v261_v38 = vrot.slane (!%p5785_p10), %v5636_v6, 3  ;;  %v262_v39 = vrot.slane (!%p5785_p10), %v5640_v8, 3  ;;  %v263_v40 = vrot.slane (!%p5785_p10), %v5644_v10, 3  ;;  %v264_v45 = vrot.slane (!%p5785_p10), %v5634_v5, 3 }
  0x87   : > { %s2094_s13 = scalar_select %p5812_p12, 1, 0  ;;  %v242_v41 = vsel %vm224_vm1, %v228_v33, %v219_v29  ;;  %v244_v42 = vsel %vm224_vm1, %v232_v34, %v220_v30  ;;  %v246_v43 = vsel %vm224_vm1, %v236_v35, %v221_v31  ;;  %v248_v44 = vsel %vm224_vm1, %v240_v36, %v222_v32 }
  0x88   : > { %s2127_s29 = scalar_select %p5820_p4, 1, 0  ;;  %v265_v46 = vrot.slane %v5638_v7, 3  ;;  %v266_v47 = vrot.slane %v5642_v9, 3  ;;  %v267_v56 = vrot.slane %v5646_v11, 3  ;;  %vm268_vm3 = vcmp.lt.s32.totalorder %v5620_v1, 5 }
  0x89   : > { %v2095_v37 = vstv %s2094_s13  ;;  %vm278_vm4 = vcmp.ge.s32.totalorder %v5625_v3, 13  ;;  %v269_v58 = vsel %vm268_vm3, %v260_v24, %v264_v45  ;;  %v273_v61 = vsel %vm268_vm3, %v264_v45, %v260_v24 }
  0x8a   : > { %vm2096_vm2 = vcmp.ne.s32.totalorder %v2095_v37, 0  ;;  %v2128_v57 = vstv %s2127_s29  ;;  %v270_v59 = vsel %vm268_vm3, %v261_v38, %v265_v46  ;;  %v271_v60 = vsel %vm268_vm3, %v262_v39, %v266_v47 }
  0x8b   : > { %v2097_v48 = vsel %vm2096_vm2, %v215_v25, 0  ;;  %v2101_v49 = vsel %vm2096_vm2, %v242_v41, 0  ;;  %v2105_v50 = vsel %vm2096_vm2, %v216_v26, 0  ;;  %v2109_v51 = vsel %vm2096_vm2, %v244_v42, 0 }
  0x8c   : > { %v2113_v52 = vsel %vm2096_vm2, %v217_v27, 0  ;;  %v2117_v53 = vsel %vm2096_vm2, %v246_v43, 0  ;;  %v2121_v54 = vsel %vm2096_vm2, %v218_v28, 0  ;;  %v2125_v55 = vsel %vm2096_vm2, %v248_v44, 0 }
  0x8d   : > { %v272_v62 = vsel %vm268_vm3, %v263_v40, %v267_v56  ;;  %v274_v63 = vsel %vm268_vm3, %v265_v46, %v261_v38  ;;  %v275_v0 = vsel %vm268_vm3, %v266_v47, %v262_v39  ;;  %v276_v12 = vsel %vm268_vm3, %v267_v56, %v263_v40 }
  0x8e   : > { %v296_v13 = vsel %vm278_vm4, %v228_v33, %v273_v61  ;;  %v298_v14 = vsel %vm278_vm4, %v232_v34, %v274_v63  ;;  %v300_v15 = vsel %vm278_vm4, %v236_v35, %v275_v0  ;;  %v302_v16 = vsel %vm278_vm4, %v240_v36, %v276_v12 }
  0x8f   : > { %vm2129_vm5 = vcmp.ne.s32.totalorder %v2128_v57, 0 }
  0x90   : > { %v2130_v17 = vsel %vm2129_vm5, %v269_v58, %v2097_v48   ;;  %v2134_v13 = vsel %vm2129_vm5, %v296_v13, %v2101_v49   ;;  %v2138_v12 = vsel %vm2129_vm5, %v270_v59, %v2105_v50   ;;  %v2142_v0 = vsel %vm2129_vm5, %v298_v14, %v2109_v51  }
  0x91   : > { %v2146_v63 = vsel %vm2129_vm5, %v271_v60, %v2113_v52   ;;  %v2150_v18 = vsel %vm2129_vm5, %v300_v15, %v2117_v53   ;;  %v2154_v61 = vsel %vm2129_vm5, %v272_v62, %v2121_v54   ;;  %v2158_v60 = vsel %vm2129_vm5, %v302_v16, %v2125_v55  }
  0x92   : > { %v7651_v62 = vmov %v2150_v18  ;;  %v7652_v14 = vmov %v2130_v17 }
  0x93 PF: > { %v322_v19 = vrot.slane %v5632_v4, 2  ;;  %v323_v20 = vrot.slane %v5636_v6, 2  ;;  %v324_v21 = vrot.slane %v5640_v8, 2  ;;  %v325_v22 = vrot.slane %v5644_v10, 2  ;;  %s2160_s18 = scalar_select %p5785_p10, 1, 0  ;;  %v4774_v14 = vphi %v5803_v14, %v7652_v14   ;;  %v4770_v13 = vphi %v5801_v13, %v2134_v13   ;;  %v4766_v12 = vphi %v5799_v12, %v2138_v12   ;;  %v4762_v0 = vphi %v5797_v0, %v2142_v0   ;;  %v4758_v63 = vphi %v5795_v63, %v2146_v63   ;;  %v4754_v62 = vphi %v5793_v62, %v7651_v62   ;;  %v4750_v61 = vphi %v5791_v61, %v2154_v61   ;;  %v4746_v60 = vphi %v5789_v60, %v2158_v60  }
  0x94   : > { %v326_v23 = vrot.slane %v5634_v5, 2  ;;  %v327_v24 = vrot.slane %v5638_v7, 2  ;;  %v328_v25 = vrot.slane %v5642_v9, 2  ;;  %v329_v26 = vrot.slane %v5646_v11, 2 }
  0x95   : > { %vm330_vm6 = vcmp.lt.s32.totalorder %v5620_v1, 6  ;;  %v343_v27 = vsub.s32 7, %v5620_v1  ;;  %vm340_vm7 = vcmp.ge.s32.totalorder %v5625_v3, 14  ;;  %v2161_v30 = vstv %s2160_s18 }
  0x96   : > { %v331_v28 = vsel %vm330_vm6, %v322_v19, %v326_v23  ;;  %v332_v29 = vsel %vm330_vm6, %v323_v20, %v327_v24  ;;  %v335_v31 = vsel %vm330_vm6, %v326_v23, %v322_v19  ;;  %v336_v32 = vsel %vm330_vm6, %v327_v24, %v323_v20 }
  0x97   : > { %v337_v33 = vsel %vm330_vm6, %v328_v25, %v324_v21  ;;  %v338_v34 = vsel %vm330_vm6, %v329_v26, %v325_v22  ;;  %v344_v35 = vrot.slane %v5634_v5, %v343_v27  ;;  %v348_v36 = vrot.slane %v5638_v7, %v343_v27 }
  0x98   : > { %v352_v37 = vrot.slane %v5642_v9, %v343_v27  ;;  %v356_v38 = vrot.slane %v5646_v11, %v343_v27  ;;  %v333_v39 = vsel %vm330_vm6, %v324_v21, %v328_v25  ;;  %v334_v40 = vsel %vm330_vm6, %v325_v22, %v329_v26 }
  0x99   : > { %vm2162_vm8 = vcmp.ne.s32.totalorder %v2161_v30, 0  ;;  %v358_v41 = vsel %vm340_vm7, %v344_v35, %v335_v31  ;;  %v360_v42 = vsel %vm340_vm7, %v348_v36, %v336_v32 }
  0x9a   : > { %v362_v43 = vsel %vm340_vm7, %v352_v37, %v337_v33  ;;  %v364_v44 = vsel %vm340_vm7, %v356_v38, %v338_v34  ;;  %v2163_v59 = vsel %vm2162_vm8, %v331_v28, %v4774_v14   ;;  %v2167_v58 = vsel %vm2162_vm8, %v358_v41, %v4770_v13  }
  0x9b   : > { %v2171_v57 = vsel %vm2162_vm8, %v332_v29, %v4766_v12   ;;  %v2175_v56 = vsel %vm2162_vm8, %v360_v42, %v4762_v0   ;;  %v2179_v55 = vsel %vm2162_vm8, %v333_v39, %v4758_v63   ;;  %v2183_v54 = vsel %vm2162_vm8, %v362_v43, %v4754_v62  }
  0x9c   : > { %v2187_v53 = vsel %vm2162_vm8, %v334_v40, %v4750_v61   ;;  %v2191_v52 = vsel %vm2162_vm8, %v364_v44, %v4746_v60  }
  0x9d PF: > { %v384_v45 = vrot.slane %v5632_v4, 1  ;;  %v385_v46 = vrot.slane %v5636_v6, 1  ;;  %v386_v47 = vrot.slane %v5640_v8, 1  ;;  %v387_v48 = vrot.slane %v5644_v10, 1  ;;  %s2193_s25 = scalar_select %p5762_p8, 1, 0  ;;  %v4806_v59 = vphi %v5780_v59, %v2163_v59   ;;  %v4802_v58 = vphi %v5778_v58, %v2167_v58   ;;  %v4798_v57 = vphi %v5776_v57, %v2171_v57   ;;  %v4794_v56 = vphi %v5774_v56, %v2175_v56   ;;  %v4790_v55 = vphi %v5772_v55, %v2179_v55   ;;  %v4786_v54 = vphi %v5770_v54, %v2183_v54   ;;  %v4782_v53 = vphi %v5768_v53, %v2187_v53   ;;  %v4778_v52 = vphi %v5766_v52, %v2191_v52  }
  0x9e   : > { %v388_v49 = vrot.slane %v5634_v5, 1  ;;  %v389_v50 = vrot.slane %v5638_v7, 1  ;;  %v390_v51 = vrot.slane %v5642_v9, 1  ;;  %v391_v60 = vrot.slane %v5646_v11, 1 }
  0x9f   : > { %vm392_vm9 = vcmp.lt.s32.totalorder %v5620_v1, 7  ;;  %v405_v61 = vsub.s32 7, %v5620_v1  ;;  %vm402_vm10 = vcmp.ge.s32.totalorder %v5625_v3, 15  ;;  %v2194_v0 = vstv %s2193_s25 }
  0xa0   : > { %v393_v62 = vsel %vm392_vm9, %v384_v45, %v388_v49  ;;  %v394_v63 = vsel %vm392_vm9, %v385_v46, %v389_v50  ;;  %v397_v12 = vsel %vm392_vm9, %v388_v49, %v384_v45  ;;  %v398_v13 = vsel %vm392_vm9, %v389_v50, %v385_v46 }
  0xa1   : > { %v399_v14 = vsel %vm392_vm9, %v390_v51, %v386_v47  ;;  %v400_v15 = vsel %vm392_vm9, %v391_v60, %v387_v48  ;;  %v406_v16 = vrot.slane %v5634_v5, %v405_v61  ;;  %v410_v17 = vrot.slane %v5638_v7, %v405_v61 }
  0xa2   : > { %v414_v18 = vrot.slane %v5642_v9, %v405_v61  ;;  %v418_v19 = vrot.slane %v5646_v11, %v405_v61  ;;  %v395_v20 = vsel %vm392_vm9, %v386_v47, %v390_v51  ;;  %v396_v21 = vsel %vm392_vm9, %v387_v48, %v391_v60 }
  0xa3   : > { %vm2195_vm11 = vcmp.ne.s32.totalorder %v2194_v0, 0  ;;  %v420_v22 = vsel %vm402_vm10, %v406_v16, %v397_v12  ;;  %v422_v23 = vsel %vm402_vm10, %v410_v17, %v398_v13 }
  0xa4   : > { %v424_v24 = vsel %vm402_vm10, %v414_v18, %v399_v14  ;;  %v426_v25 = vsel %vm402_vm10, %v418_v19, %v400_v15  ;;  %v2196_v51 = vsel %vm2195_vm11, %v393_v62, %v4806_v59   ;;  %v2200_v50 = vsel %vm2195_vm11, %v420_v22, %v4802_v58  }
  0xa5   : > { %v2204_v49 = vsel %vm2195_vm11, %v394_v63, %v4798_v57   ;;  %v2208_v48 = vsel %vm2195_vm11, %v422_v23, %v4794_v56   ;;  %v2212_v47 = vsel %vm2195_vm11, %v395_v20, %v4790_v55   ;;  %v2216_v46 = vsel %vm2195_vm11, %v424_v24, %v4786_v54  }
  0xa6   : > { %v2220_v45 = vsel %vm2195_vm11, %v396_v21, %v4782_v53   ;;  %v2224_v44 = vsel %vm2195_vm11, %v426_v25, %v4778_v52  }
  0xa7 PF: > { %s2226_s28 = scalar_select %p5739_p7, 1, 0  ;;  %v4838_v51 = vphi %v5757_v51, %v2196_v51   ;;  %v4834_v50 = vphi %v5755_v50, %v2200_v50   ;;  %v4830_v49 = vphi %v5753_v49, %v2204_v49   ;;  %v4826_v48 = vphi %v5751_v48, %v2208_v48   ;;  %v4822_v47 = vphi %v5749_v47, %v2212_v47   ;;  %v4818_v46 = vphi %v5747_v46, %v2216_v46   ;;  %v4814_v45 = vphi %v5745_v45, %v2220_v45   ;;  %v4810_v44 = vphi %v5743_v44, %v2224_v44  }
  0xa9   : > { %v2227_v3 = vstv %s2226_s28 }
  0xaa   : > { %vm2228_vm12 = vcmp.ne.s32.totalorder %v2227_v3, 0 }
  0xab   : > { %v2229_v43 = vsel %vm2228_vm12, %v5632_v4, %v4838_v51   ;;  %v2233_v42 = vsel %vm2228_vm12, %v5634_v5, %v4834_v50   ;;  %v2237_v41 = vsel %vm2228_vm12, %v5636_v6, %v4830_v49   ;;  %v2241_v40 = vsel %vm2228_vm12, %v5638_v7, %v4826_v48  }
  0xac   : > { %v2245_v39 = vsel %vm2228_vm12, %v5640_v8, %v4822_v47   ;;  %v2249_v38 = vsel %vm2228_vm12, %v5642_v9, %v4818_v46   ;;  %v2253_v37 = vsel %vm2228_vm12, %v5644_v10, %v4814_v45   ;;  %v2257_v36 = vsel %vm2228_vm12, %v5646_v11, %v4810_v44  }
  0xad PF: > { %v465_v52 = vrot.slane %v5632_v4, 7  ;;  %v466_v53 = vrot.slane %v5636_v6, 7  ;;  %v467_v54 = vrot.slane %v5640_v8, 7  ;;  %v468_v55 = vrot.slane %v5644_v10, 7  ;;  %s2259_s4 = scalar_select %p5716_p5, 1, 0  ;;  %v4870_v43 = vphi %v5734_v43, %v2229_v43   ;;  %v4866_v42 = vphi %v5732_v42, %v2233_v42   ;;  %v4862_v41 = vphi %v5730_v41, %v2237_v41   ;;  %v4858_v40 = vphi %v5728_v40, %v2241_v40   ;;  %v4854_v39 = vphi %v5726_v39, %v2245_v39   ;;  %v4850_v38 = vphi %v5724_v38, %v2249_v38   ;;  %v4846_v37 = vphi %v5722_v37, %v2253_v37   ;;  %v4842_v36 = vphi %v5720_v36, %v2257_v36  }
  0xae   : > { %v469_v56 = vrot.slane %v5634_v5, 7  ;;  %v470_v57 = vrot.slane %v5638_v7, 7  ;;  %v471_v58 = vrot.slane %v5642_v9, 7  ;;  %v472_v59 = vrot.slane %v5646_v11, 7 }
  0xaf   : > { %vm473_vm13 = vcmp.lt.s32.totalorder %v5620_v1, 1  ;;  %v485_v26 = vsub.s32 0, %v5620_v1  ;;  %v2260_v29 = vstv %s2259_s4 }
  0xb0   : > { %v474_v27 = vsel %vm473_vm13, %v465_v52, %v469_v56  ;;  %v475_v28 = vsel %vm473_vm13, %v466_v53, %v470_v57  ;;  %v478_v30 = vsel %vm473_vm13, %v469_v56, %v465_v52  ;;  %v479_v31 = vsel %vm473_vm13, %v470_v57, %v466_v53 }
  0xb1   : > { %v480_v32 = vsel %vm473_vm13, %v471_v58, %v467_v54  ;;  %v481_v33 = vsel %vm473_vm13, %v472_v59, %v468_v55  ;;  %v486_v34 = vrot.slane %v5632_v4, %v485_v26  ;;  %v490_v35 = vrot.slane %v5636_v6, %v485_v26 }
  0xb2   : > { %v494_v44 = vrot.slane %v5640_v8, %v485_v26  ;;  %v498_v45 = vrot.slane %v5644_v10, %v485_v26  ;;  %v476_v46 = vsel %vm473_vm13, %v467_v54, %v471_v58  ;;  %v477_v47 = vsel %vm473_vm13, %v468_v55, %v472_v59 }
  0xb3   : > { %vm2261_vm14 = vcmp.ne.s32.totalorder %v2260_v29, 0  ;;  %v499_v48 = vsel %vm473_vm13, %v486_v34, %v478_v30  ;;  %v501_v49 = vsel %vm473_vm13, %v490_v35, %v479_v31 }
  0xb4   : > { %v503_v50 = vsel %vm473_vm13, %v494_v44, %v480_v32  ;;  %v505_v51 = vsel %vm473_vm13, %v498_v45, %v481_v33  ;;  %v2262_v35 = vsel %vm2261_vm14, %v499_v48, %v4870_v43   ;;  %v2266_v34 = vsel %vm2261_vm14, %v474_v27, %v4866_v42  }
  0xb5   : > { %v2270_v33 = vsel %vm2261_vm14, %v501_v49, %v4862_v41   ;;  %v2274_v32 = vsel %vm2261_vm14, %v475_v28, %v4858_v40   ;;  %v2278_v31 = vsel %vm2261_vm14, %v503_v50, %v4854_v39   ;;  %v2282_v30 = vsel %vm2261_vm14, %v476_v46, %v4850_v38  }
  0xb6   : > { %v2286_v29 = vsel %vm2261_vm14, %v505_v51, %v4846_v37   ;;  %v2290_v28 = vsel %vm2261_vm14, %v477_v47, %v4842_v36  }
  0xb7 PF: > { %v526_v36 = vrot.slane %v5632_v4, 6  ;;  %v527_v37 = vrot.slane %v5636_v6, 6  ;;  %v528_v38 = vrot.slane %v5640_v8, 6  ;;  %v529_v39 = vrot.slane %v5644_v10, 6  ;;  %s2292_s26 = scalar_select %p5693_p3, 1, 0  ;;  %v4902_v35 = vphi %v5711_v35, %v2262_v35   ;;  %v4898_v34 = vphi %v5709_v34, %v2266_v34   ;;  %v4894_v33 = vphi %v5707_v33, %v2270_v33   ;;  %v4890_v32 = vphi %v5705_v32, %v2274_v32   ;;  %v4886_v31 = vphi %v5703_v31, %v2278_v31   ;;  %v4882_v30 = vphi %v5701_v30, %v2282_v30   ;;  %v4878_v29 = vphi %v5699_v29, %v2286_v29   ;;  %v4874_v28 = vphi %v5697_v28, %v2290_v28  }
  0xb8   : > { %v530_v40 = vrot.slane %v5634_v5, 6  ;;  %v531_v41 = vrot.slane %v5638_v7, 6  ;;  %v532_v42 = vrot.slane %v5642_v9, 6  ;;  %v533_v43 = vrot.slane %v5646_v11, 6 }
  0xb9   : > { %vm534_vm15 = vcmp.lt.s32.totalorder %v5620_v1, 2  ;;  %v546_v60 = vsub.s32 0, %v5620_v1  ;;  %v2293_v63 = vstv %s2292_s26 }
  0xba   : > { %v535_v61 = vsel %vm534_vm15, %v526_v36, %v530_v40  ;;  %v536_v62 = vsel %vm534_vm15, %v527_v37, %v531_v41  ;;  %v539_v0 = vsel %vm534_vm15, %v530_v40, %v526_v36  ;;  %v540_v12 = vsel %vm534_vm15, %v531_v41, %v527_v37 }
  0xbb   : > { %v541_v13 = vsel %vm534_vm15, %v532_v42, %v528_v38  ;;  %v542_v14 = vsel %vm534_vm15, %v533_v43, %v529_v39  ;;  %v547_v15 = vrot.slane %v5632_v4, %v546_v60  ;;  %v551_v16 = vrot.slane %v5636_v6, %v546_v60 }
  0xbc   : > { %v555_v17 = vrot.slane %v5640_v8, %v546_v60  ;;  %v559_v18 = vrot.slane %v5644_v10, %v546_v60  ;;  %v537_v19 = vsel %vm534_vm15, %v528_v38, %v532_v42  ;;  %v538_v20 = vsel %vm534_vm15, %v529_v39, %v533_v43 }
  0xbd   : > { %vm2294_vm0 = vcmp.ne.s32.totalorder %v2293_v63, 0  ;;  %v560_v21 = vsel %vm534_vm15, %v547_v15, %v539_v0  ;;  %v562_v22 = vsel %vm534_vm15, %v551_v16, %v540_v12 }
  0xbe   : > { %v564_v23 = vsel %vm534_vm15, %v555_v17, %v541_v13  ;;  %v566_v24 = vsel %vm534_vm15, %v559_v18, %v542_v14  ;;  %v2295_v27 = vsel %vm2294_vm0, %v560_v21, %v4902_v35   ;;  %v2299_v26 = vsel %vm2294_vm0, %v535_v61, %v4898_v34  }
  0xbf   : > { %v2303_v25 = vsel %vm2294_vm0, %v562_v22, %v4894_v33   ;;  %v2307_v3 = vsel %vm2294_vm0, %v536_v62, %v4890_v32   ;;  %v2311_v23 = vsel %vm2294_vm0, %v564_v23, %v4886_v31   ;;  %v2315_v22 = vsel %vm2294_vm0, %v537_v19, %v4882_v30  }
  0xc0   : > { %v2319_v21 = vsel %vm2294_vm0, %v566_v24, %v4878_v29   ;;  %v2323_v20 = vsel %vm2294_vm0, %v538_v20, %v4874_v28   ;;  %v7653_v24 = vmov %v2307_v3 }
  0xc1 PF: > { %v587_v52 = vrot.slane %v5632_v4, 5  ;;  %v588_v53 = vrot.slane %v5636_v6, 5  ;;  %v589_v54 = vrot.slane %v5640_v8, 5  ;;  %v590_v55 = vrot.slane %v5644_v10, 5  ;;  %s2325_s23 = scalar_select %p5670_p13, 1, 0  ;;  %v4934_v27 = vphi %v5688_v27, %v2295_v27   ;;  %v4930_v26 = vphi %v5686_v26, %v2299_v26   ;;  %v4926_v25 = vphi %v5684_v25, %v2303_v25   ;;  %v4922_v24 = vphi %v5682_v24, %v7653_v24   ;;  %v4918_v23 = vphi %v5680_v23, %v2311_v23   ;;  %v4914_v22 = vphi %v5678_v22, %v2315_v22   ;;  %v4910_v21 = vphi %v5676_v21, %v2319_v21   ;;  %v4906_v20 = vphi %v5674_v20, %v2323_v20  }
  0xc2   : > { %v591_v56 = vrot.slane %v5634_v5, 5  ;;  %v592_v57 = vrot.slane %v5638_v7, 5  ;;  %v593_v58 = vrot.slane %v5642_v9, 5  ;;  %v594_v59 = vrot.slane %v5646_v11, 5 }
  0xc3   : > { %vm595_vm1 = vcmp.lt.s32.totalorder %v5620_v1, 3  ;;  %v607_v28 = vsub.s32 0, %v5620_v1  ;;  %v2326_v31 = vstv %s2325_s23 }
  0xc4   : > { %v596_v29 = vsel %vm595_vm1, %v587_v52, %v591_v56  ;;  %v597_v30 = vsel %vm595_vm1, %v588_v53, %v592_v57  ;;  %v600_v32 = vsel %vm595_vm1, %v591_v56, %v587_v52  ;;  %v601_v33 = vsel %vm595_vm1, %v592_v57, %v588_v53 }
  0xc5   : > { %v602_v34 = vsel %vm595_vm1, %v593_v58, %v589_v54  ;;  %v603_v35 = vsel %vm595_vm1, %v594_v59, %v590_v55  ;;  %v608_v44 = vrot.slane %v5632_v4, %v607_v28  ;;  %v612_v45 = vrot.slane %v5636_v6, %v607_v28 }
  0xc6   : > { %v616_v46 = vrot.slane %v5640_v8, %v607_v28  ;;  %v620_v47 = vrot.slane %v5644_v10, %v607_v28  ;;  %v598_v48 = vsel %vm595_vm1, %v589_v54, %v593_v58  ;;  %v599_v49 = vsel %vm595_vm1, %v590_v55, %v594_v59 }
  0xc7   : > { %vm2327_vm2 = vcmp.ne.s32.totalorder %v2326_v31, 0  ;;  %v621_v50 = vsel %vm595_vm1, %v608_v44, %v600_v32  ;;  %v623_v51 = vsel %vm595_vm1, %v612_v45, %v601_v33 }
  0xc8   : > { %v625_v36 = vsel %vm595_vm1, %v616_v46, %v602_v34  ;;  %v627_v37 = vsel %vm595_vm1, %v620_v47, %v603_v35  ;;  %v2328_v19 = vsel %vm2327_vm2, %v621_v50, %v4934_v27   ;;  %v2332_v18 = vsel %vm2327_vm2, %v596_v29, %v4930_v26  }
  0xc9   : > { %v2336_v17 = vsel %vm2327_vm2, %v623_v51, %v4926_v25   ;;  %v2340_v16 = vsel %vm2327_vm2, %v597_v30, %v4922_v24   ;;  %v2344_v15 = vsel %vm2327_vm2, %v625_v36, %v4918_v23   ;;  %v2348_v14 = vsel %vm2327_vm2, %v598_v48, %v4914_v22  }
  0xca   : > { %v2352_v13 = vsel %vm2327_vm2, %v627_v37, %v4910_v21   ;;  %v2356_v12 = vsel %vm2327_vm2, %v599_v49, %v4906_v20  }
  0xcb PF: > { %v648_v25 = vrot.slane %v5632_v4, 4  ;;  %v649_v26 = vrot.slane %v5636_v6, 4  ;;  %v650_v27 = vrot.slane %v5640_v8, 4  ;;  %v651_v38 = vrot.slane %v5644_v10, 4  ;;  %s2358_s17 = scalar_select %p2045_p11, 1, 0  ;;  %v4966_v19 = vphi %v5665_v19, %v2328_v19   ;;  %v4962_v18 = vphi %v5663_v18, %v2332_v18   ;;  %v4958_v17 = vphi %v5661_v17, %v2336_v17   ;;  %v4954_v16 = vphi %v5659_v16, %v2340_v16   ;;  %v4950_v15 = vphi %v5657_v15, %v2344_v15   ;;  %v4946_v14 = vphi %v5655_v14, %v2348_v14   ;;  %v4942_v13 = vphi %v5653_v13, %v2352_v13   ;;  %v4938_v12 = vphi %v5651_v12, %v2356_v12  }
  0xcc   : > { %v652_v39 = vrot.slane %v5634_v5, 4  ;;  %v653_v40 = vrot.slane %v5638_v7, 4  ;;  %v654_v41 = vrot.slane %v5642_v9, 4  ;;  %v655_v42 = vrot.slane %v5646_v11, 4  ;;  %p698_p6 = scmp.gt.s32.totalorder %s5627_s12, 0  ;;  %p2060_p0 = scmp.lt.s32.totalorder %s5627_s12, 8 }
  0xcd   : > { %vm656_vm3 = vcmp.lt.s32.totalorder %v5620_v1, 4  ;;  %v668_v43 = vsub.s32 0, %v5620_v1  ;;  %v2359_v5 = vstv %s2358_s17  ;;  %v6266_v1 = vmov 0  }
  0xce   : > { %v657_v60 = vsel %vm656_vm3, %v648_v25, %v652_v39  ;;  %v658_v61 = vsel %vm656_vm3, %v649_v26, %v653_v40  ;;  %s699_s15 = scalar_select %p698_p6, %s5627_s12, 0  ;;  %v661_v7 = vsel %vm656_vm3, %v652_v39, %v648_v25  ;;  %v662_v9 = vsel %vm656_vm3, %v653_v40, %v649_v26 }
  0xcf   : > { %v663_v11 = vsel %vm656_vm3, %v654_v41, %v650_v27  ;;  %v664_v62 = vsel %vm656_vm3, %v655_v42, %v651_v38  ;;  %v669_v63 = vrot.slane %v5632_v4, %v668_v43  ;;  %v673_v0 = vrot.slane %v5636_v6, %v668_v43 }
  0xd0   : > { %v677_v20 = vrot.slane %v5640_v8, %v668_v43  ;;  %v681_v21 = vrot.slane %v5644_v10, %v668_v43  ;;  %s7731_s15 = smov (!%p2060_p0, %s699_s15), 8  ;;  %v659_v22 = vsel %vm656_vm3, %v650_v27, %v654_v41  ;;  %v660_v23 = vsel %vm656_vm3, %v651_v38, %v655_v42 }
  0xd1   : > { %vm2360_vm4 = vcmp.ne.s32.totalorder %v2359_v5, 0  ;;  %v682_v4 = vsel %vm656_vm3, %v669_v63, %v661_v7  ;;  %v684_v6 = vsel %vm656_vm3, %v673_v0, %v662_v9  ;;  %p702_p9 = scmp.ne.s32.totalorder %s7731_s15, 0  ;;  %p2065_p1 = scmp.eq.s32.totalorder %s7731_s15, 0 }
  0xd2   : > { %v686_v8 = vsel %vm656_vm3, %v677_v20, %v663_v11  ;;  %v688_v10 = vsel %vm656_vm3, %v681_v21, %v664_v62  ;;  %v6249_v24 = vsel %vm2360_vm4, %v682_v4, %v4966_v19  ;;  %v6251_v3 = vsel %vm2360_vm4, %v657_v60, %v4962_v18  ;;  %s2066_s12 = sadd.s32 (!%p2065_p1), 4294967295, %s7731_s15 }
  0xd3   : > { %v6253_v52 = vsel %vm2360_vm4, %v684_v6, %v4958_v17  ;;  %v6255_v53 = vsel %vm2360_vm4, %v658_v61, %v4954_v16  ;;  %v6257_v54 = vsel %vm2360_vm4, %v686_v8, %v4950_v15  ;;  %v6259_v55 = vsel %vm2360_vm4, %v659_v22, %v4946_v14  ;;  %705 = sbr.rel (%p2065_p1) target bundleno = 2833 (0xb11), region = 100  ;;  %p6283_p2 = scmp.ne.s32.totalorder (!%p2065_p1), %s2066_s12, 0 }
  0xd4   : > { %v6261_v56 = vsel %vm2360_vm4, %v688_v10, %v4942_v13  ;;  %v6263_v57 = vsel %vm2360_vm4, %v660_v23, %v4938_v12  ;;  %v6268_v19 = vmov 0   ;;  %v6270_v18 = vmov 0   ;;  %p2067_p11 = scmp.eq.s32.totalorder (!%p2065_p1), %s2066_s12, 0 }
  0xd5   : > { %v6272_v17 = vmov 0   ;;  %v6274_v16 = vmov 0   ;;  %v6276_v15 = vmov 0   ;;  %v6278_v14 = vmov 0  }
  0xd6   : > { %v6280_v13 = vmov 0   ;;  %v6287_v12 = vmov (!%p2065_p1), 0   ;;  %v6289_v58 = vmov (!%p2065_p1), 0   ;;  %v6291_v59 = vmov (!%p2065_p1), 0  }
  0xd7   : > { %v6293_v28 = vmov (!%p2065_p1), 0   ;;  %v6295_v29 = vmov (!%p2065_p1), 0   ;;  %v6297_v30 = vmov (!%p2065_p1), 0   ;;  %v6299_v31 = vmov (!%p2065_p1), 0  }
  0xd8   : > { %v6301_v32 = vmov (!%p2065_p1), 0  }
  0xda   : > { %710 = sbr.rel (%p2067_p11) target bundleno = 2466 (0x9a2), region = 104  ;;  %s2068_s6 = sadd.s32 (!%p2067_p11), 4294967294, %s7731_s15  ;;  %v6308_v33 = vmov (!%p2067_p11), 0   ;;  %v6310_v34 = vmov (!%p2067_p11), 0   ;;  %v6312_v35 = vmov (!%p2067_p11), 0   ;;  %v6314_v44 = vmov (!%p2067_p11), 0  }
  0xdb   : > { %p6304_p13 = scmp.ne.s32.totalorder (!%p2067_p11), %s2068_s6, 0  ;;  %p2069_p3 = scmp.eq.s32.totalorder (!%p2067_p11), %s2068_s6, 0  ;;  %v6316_v45 = vmov (!%p2067_p11), 0   ;;  %v6318_v46 = vmov (!%p2067_p11), 0   ;;  %v6320_v47 = vmov (!%p2067_p11), 0   ;;  %v6322_v48 = vmov (!%p2067_p11), 0  }
  0xe1   : > { %715 = sbr.rel (%p2069_p3) target bundleno = 2099 (0x833), region = 108  ;;  %s2070_s10 = sadd.s32 (!%p2069_p3), 4294967293, %s7731_s15  ;;  %v6329_v49 = vmov (!%p2069_p3), 0   ;;  %v6331_v50 = vmov (!%p2069_p3), 0   ;;  %v6333_v51 = vmov (!%p2069_p3), 0   ;;  %v6335_v36 = vmov (!%p2069_p3), 0  }
  0xe2   : > { %p6325_p5 = scmp.ne.s32.totalorder (!%p2069_p3), %s2070_s10, 0  ;;  %p2071_p7 = scmp.eq.s32.totalorder (!%p2069_p3), %s2070_s10, 0  ;;  %v6337_v37 = vmov (!%p2069_p3), 0   ;;  %v6339_v25 = vmov (!%p2069_p3), 0   ;;  %v6341_v26 = vmov (!%p2069_p3), 0   ;;  %v6343_v27 = vmov (!%p2069_p3), 0  }
  0xe8   : > { %720 = sbr.rel (%p2071_p7) target bundleno = 1732 (0x6c4), region = 112  ;;  %s2072_s9 = sadd.s32 (!%p2071_p7), 4294967292, %s7731_s15  ;;  %v6350_v38 = vmov (!%p2071_p7), 0   ;;  %v6352_v39 = vmov (!%p2071_p7), 0   ;;  %v6354_v40 = vmov (!%p2071_p7), 0   ;;  %v6356_v41 = vmov (!%p2071_p7), 0  }
  0xe9   : > { %p6346_p8 = scmp.eq.s32.totalorder (!%p2071_p7), %s2072_s9, 0  ;;  %v6358_v42 = vmov (!%p2071_p7), 0   ;;  %v6360_v43 = vmov (!%p2071_p7), 0   ;;  %v6362_v60 = vmov (!%p2071_p7), 0   ;;  %v6364_v61 = vmov (!%p2071_p7), 0  }
  0xef   : > { %725 = sbr.rel (%p6346_p8) target bundleno = 1726 (0x6be), region = 116  ;;  %s2074_s13 = sadd.s32 (!%p6346_p8), 4294967291, %s7731_s15  ;;  %v6373_v5 = vmov (!%p6346_p8), 0   ;;  %v6375_v7 = vmov (!%p6346_p8), 0   ;;  %v6377_v9 = vmov (!%p6346_p8), 0   ;;  %v6379_v11 = vmov (!%p6346_p8), 0  }
  0xf0   : > { %p6369_p10 = scmp.ne.s32.totalorder (!%p6346_p8), %s2074_s13, 0  ;;  %p2075_p12 = scmp.eq.s32.totalorder (!%p6346_p8), %s2074_s13, 0  ;;  %v6381_v62 = vmov (!%p6346_p8), 0   ;;  %v6383_v63 = vmov (!%p6346_p8), 0   ;;  %v6385_v0 = vmov (!%p6346_p8), 0   ;;  %v6387_v20 = vmov (!%p6346_p8), 0  }
  0xf6   : > { %730 = sbr.rel (%p2075_p12) target bundleno = 1359 (0x54f), region = 120  ;;  %s2076_s18 = sadd.s32 (!%p2075_p12), 4294967290, %s7731_s15  ;;  %v6394_v21 = vmov (!%p2075_p12), 0   ;;  %v6396_v22 = vmov (!%p2075_p12), 0   ;;  %v6398_v23 = vmov (!%p2075_p12), 0   ;;  %v6400_v4 = vmov (!%p2075_p12), 0  }
  0xf7   : > { %p6390_p4 = scmp.ne.s32.totalorder (!%p2075_p12), %s2076_s18, 0  ;;  %p2077_p6 = scmp.eq.s32.totalorder (!%p2075_p12), %s2076_s18, 0  ;;  %v6402_v6 = vmov (!%p2075_p12), 0   ;;  %v6404_v8 = vmov (!%p2075_p12), 0   ;;  %v6406_v10 = vmov (!%p2075_p12), 0   ;;  %v6408_v1 = vmov (!%p2075_p12), 0  }
  0xfd   : > { %735 = sbr.rel (%p2077_p6) target bundleno = 992 (0x3e0), region = 124  ;;  %s2078_s28 = sadd.s32 (!%p2077_p6), 4294967289, %s7731_s15  ;;  %v6415_v19 = vmov (!%p2077_p6), 0   ;;  %v6417_v18 = vmov (!%p2077_p6), 0   ;;  %v6419_v17 = vmov (!%p2077_p6), 0   ;;  %v6421_v16 = vmov (!%p2077_p6), 0  }
  0xfe   : > { %p6411_p0 = scmp.ne.s32.totalorder (!%p2077_p6), %s2078_s28, 0  ;;  %p2079_p1 = scmp.eq.s32.totalorder (!%p2077_p6), %s2078_s28, 0  ;;  %v6423_v15 = vmov (!%p2077_p6), 0   ;;  %v6425_v14 = vmov (!%p2077_p6), 0   ;;  %v6427_v13 = vmov (!%p2077_p6), 0   ;;  %v6429_v12 = vmov (!%p2077_p6), 0  }
 0x104   : > { %740 = sbr.rel (%p2079_p1) target bundleno = 625 (0x271), region = 128  ;;  %s5452_s26 = smov (!%p2079_p1), 16   ;;  %v5453_v58 = vmov (!%p2079_p1), 15   ;;  %vm741_vm5 = vcmask (!%p2079_p1), 1047680   ;;  %vm790_vm6 = vcmp.ge.s32.totalorder (!%p2079_p1), %v5622_v2, 12 }
 0x105   : > { %742 = vrot.lane.b32.xlu0 (!%p2079_p1), %v6249_v24, %s5452_s26  ;;  %748 = vrot.lane.b32.xlu1 (!%p2079_p1), %v6253_v52, %s5452_s26  ;;  %s5454_s23 = smov (!%p2079_p1), 124  }
 0x106   : > { %3915 = vset.pattern.permute.xlu1 (!%p2079_p1), %v5453_v58  ;;  %3914 = vset.pattern.permute.xlu0 (!%p2079_p1), %v5453_v58 }
 0x109   : > { %745 = vrot.lane.b32.xlu0 (!%p2079_p1), %v6251_v3, %s5452_s26  ;;  %751 = vrot.lane.b32.xlu1 (!%p2079_p1), %v6255_v53, %s5452_s26 }
 0x10d   : > { %754 = vrot.lane.b32.xlu0 %v6257_v54, %s5452_s26  ;;  %757 = vrot.lane.b32.xlu1 %v6259_v55, %s5452_s26 }
 0x111   : > { %760 = vrot.lane.b32.xlu0 %v6261_v56, %s5452_s26  ;;  %763 = vrot.lane.b32.xlu1 %v6263_v57, %s5452_s26 }
 0x177   : > { %v743_v59 = vpop.permute.xlu0 %742  ;;  %v749_v28 = vpop.permute.xlu1 %748 }
 0x178   : > { %v744_v29 = vsel %vm741_vm5, %v743_v59, %v6249_v24  ;;  %v750_v30 = vsel %vm741_vm5, %v749_v28, %v6253_v52 }
 0x179   : > { %766 = vrot.lane.b32.xlu0 %v744_v29, %s5452_s26 }
 0x17b   : > { %v746_v31 = vpop.permute.xlu0 %745  ;;  %v752_v32 = vpop.permute.xlu1 %751 }
 0x17c   : > { %v747_v33 = vsel %vm741_vm5, %v746_v31, %v6251_v3  ;;  %v753_v34 = vsel %vm741_vm5, %v752_v32, %v6255_v53 }
 0x17d   : > { %768 = vrot.lane.b32.xlu1 %v747_v33, %s5452_s26  ;;  %770 = vrot.lane.b32.xlu0 %v750_v30, %s5452_s26 }
 0x17f   : > { %v755_v35 = vpop.permute.xlu0 %754  ;;  %v758_v44 = vpop.permute.xlu1 %757 }
 0x180   : > { %v756_v45 = vsel %vm741_vm5, %v755_v35, %v6257_v54  ;;  %v759_v46 = vsel %vm741_vm5, %v758_v44, %v6259_v55 }
 0x181   : > { %772 = vrot.lane.b32.xlu1 %v753_v34, %s5452_s26  ;;  %774 = vrot.lane.b32.xlu0 %v756_v45, %s5452_s26 }
 0x183   : > { %v761_v47 = vpop.permute.xlu0 %760  ;;  %v764_v48 = vpop.permute.xlu1 %763 }
 0x184   : > { %v762_v49 = vsel %vm741_vm5, %v761_v47, %v6261_v56  ;;  %v765_v50 = vsel %vm741_vm5, %v764_v48, %v6263_v57 }
 0x185   : > { %776 = vrot.lane.b32.xlu1 %v759_v46, %s5452_s26  ;;  %778 = vrot.lane.b32.xlu0 %v762_v49, %s5452_s26 }
 0x189   : > { %780 = vrot.lane.b32.xlu1 %v765_v50, %s5452_s26  ;;  %793 = vperm.xlu0 %3914, %v6249_v24  }
 0x18d   : > { %798 = vperm.xlu1 %3915, %v6251_v3   ;;  %808 = vperm.xlu0 %3914, %v6255_v53  }
 0x191   : > { %803 = vperm.xlu1 %3915, %v6253_v52   ;;  %818 = vperm.xlu0 %3914, %v6259_v55  }
 0x195   : > { %813 = vperm.xlu1 %3915, %v6257_v54   ;;  %828 = vperm.xlu0 %3914, %v6263_v57  }
 0x199   : > { %823 = vperm.xlu1 %3915, %v6261_v56  }
 0x1eb   : > { %v767_v51 = vpop.permute.xlu0 %766 }
 0x1ec   : > { %v782_v36 = vsel %vm741_vm5, %v767_v51, %v6249_v24 }
 0x1ed   : > { %839 = vrot.lane.b32.xlu1 %v782_v36, %s5454_s23 }
 0x1ef   : > { %v769_v37 = vpop.permute.xlu1 %768  ;;  %v771_v25 = vpop.permute.xlu0 %770 }
 0x1f0   : > { %v783_v26 = vsel %vm741_vm5, %v769_v37, %v6251_v3  ;;  %v784_v27 = vsel %vm741_vm5, %v771_v25, %v6253_v52 }
 0x1f1   : > { %841 = vrot.lane.b32.xlu0 %v783_v26, %s5454_s23  ;;  %843 = vrot.lane.b32.xlu1 %v784_v27, %s5454_s23 }
 0x1f3   : > { %v773_v38 = vpop.permute.xlu1 %772  ;;  %v775_v39 = vpop.permute.xlu0 %774 }
 0x1f4   : > { %v785_v40 = vsel %vm741_vm5, %v773_v38, %v6255_v53  ;;  %v786_v41 = vsel %vm741_vm5, %v775_v39, %v6257_v54 }
 0x1f5   : > { %845 = vrot.lane.b32.xlu0 %v785_v40, %s5454_s23  ;;  %847 = vrot.lane.b32.xlu1 %v786_v41, %s5454_s23 }
 0x1f7   : > { %v777_v42 = vpop.permute.xlu1 %776  ;;  %v779_v43 = vpop.permute.xlu0 %778 }
 0x1f8   : > { %v787_v60 = vsel %vm741_vm5, %v777_v42, %v6259_v55  ;;  %v788_v61 = vsel %vm741_vm5, %v779_v43, %v6261_v56 }
 0x1f9   : > { %849 = vrot.lane.b32.xlu0 %v787_v60, %s5454_s23  ;;  %851 = vrot.lane.b32.xlu1 %v788_v61, %s5454_s23 }
 0x1fb   : > { %v781_v5 = vpop.permute.xlu1 %780 }
 0x1fc   : > { %v789_v7 = vsel %vm741_vm5, %v781_v5, %v6263_v57 }
 0x1fd   : > { %853 = vrot.lane.b32.xlu0 %v789_v7, %s5454_s23 }
 0x208   : > { %v794_v11 = vpop.permute.xlu0 %793 }
 0x20c   : > { %v799_v9 = vpop.permute.xlu1 %798  ;;  %v809_v63 = vpop.permute.xlu0 %808 }
 0x210   : > { %v804_v62 = vpop.permute.xlu1 %803  ;;  %v819_v20 = vpop.permute.xlu0 %818 }
 0x214   : > { %v814_v0 = vpop.permute.xlu1 %813  ;;  %v829_v22 = vpop.permute.xlu0 %828 }
 0x218   : > { %v824_v21 = vpop.permute.xlu1 %823 }
 0x25f   : > { %v840_v23 = vpop.permute.xlu1 %839 }
 0x260   : > { %v863_v12 = vsel %vm790_vm6, %v794_v11, %v840_v23  }
 0x263   : > { %v844_v4 = vpop.permute.xlu1 %843  ;;  %v842_v6 = vpop.permute.xlu0 %841 }
 0x264   : > { %v865_v14 = vsel %vm790_vm6, %v804_v62, %v844_v4   ;;  %v864_v13 = vsel %vm790_vm6, %v799_v9, %v842_v6  }
 0x267   : > { %v848_v8 = vpop.permute.xlu1 %847  ;;  %v846_v10 = vpop.permute.xlu0 %845 }
 0x268   : > { %v867_v16 = vsel %vm790_vm6, %v814_v0, %v848_v8   ;;  %v866_v15 = vsel %vm790_vm6, %v809_v63, %v846_v10  }
 0x26b   : > { %v852_v1 = vpop.permute.xlu1 %851  ;;  %v850_v19 = vpop.permute.xlu0 %849 }
 0x26c   : > { %v869_v18 = vsel %vm790_vm6, %v824_v21, %v852_v1   ;;  %v868_v17 = vsel %vm790_vm6, %v819_v20, %v850_v19  }
 0x26f   : > { %v854_v58 = vpop.permute.xlu0 %853 }
 0x270   : > { %v870_v19 = vsel %vm790_vm6, %v829_v22, %v854_v58  }
 0x271 PF: > { %881 = sbr.rel (%p6411_p0) target bundleno = 990 (0x3de), region = 132  ;;  %s5455_s17 = smov (!%p6411_p0), 16   ;;  %v5456_v59 = vmov (!%p6411_p0), 15   ;;  %vm882_vm7 = vcmask (!%p6411_p0), 1047680   ;;  %vm931_vm8 = vcmp.ge.s32.totalorder (!%p6411_p0), %v5622_v2, 13  ;;  %v4998_v12 = vphi %v6429_v12, %v863_v12   ;;  %v4994_v13 = vphi %v6427_v13, %v864_v13   ;;  %v4990_v14 = vphi %v6425_v14, %v865_v14   ;;  %v4986_v15 = vphi %v6423_v15, %v866_v15   ;;  %v4982_v16 = vphi %v6421_v16, %v867_v16   ;;  %v4978_v17 = vphi %v6419_v17, %v868_v17   ;;  %v4974_v18 = vphi %v6417_v18, %v869_v18   ;;  %v4970_v19 = vphi %v6415_v19, %v870_v19  }
 0x272   : > { %883 = vrot.lane.b32.xlu0 (!%p6411_p0), %v6249_v24, %s5455_s17  ;;  %889 = vrot.lane.b32.xlu1 (!%p6411_p0), %v6253_v52, %s5455_s17  ;;  %s5457_s12 = smov (!%p6411_p0), 125  }
 0x273   : > { %3917 = vset.pattern.permute.xlu1 (!%p6411_p0), %v5456_v59  ;;  %3916 = vset.pattern.permute.xlu0 (!%p6411_p0), %v5456_v59 }
 0x276   : > { %886 = vrot.lane.b32.xlu0 (!%p6411_p0), %v6251_v3, %s5455_s17  ;;  %892 = vrot.lane.b32.xlu1 (!%p6411_p0), %v6255_v53, %s5455_s17 }
 0x27a   : > { %895 = vrot.lane.b32.xlu0 %v6257_v54, %s5455_s17  ;;  %898 = vrot.lane.b32.xlu1 %v6259_v55, %s5455_s17 }
 0x27e   : > { %901 = vrot.lane.b32.xlu0 %v6261_v56, %s5455_s17  ;;  %904 = vrot.lane.b32.xlu1 %v6263_v57, %s5455_s17 }
 0x2e4   : > { %v884_v18 = vpop.permute.xlu0 %883  ;;  %v890_v17 = vpop.permute.xlu1 %889 }
 0x2e5   : > { %v885_v16 = vsel %vm882_vm7, %v884_v18, %v6249_v24  ;;  %v891_v15 = vsel %vm882_vm7, %v890_v17, %v6253_v52 }
 0x2e6   : > { %907 = vrot.lane.b32.xlu0 %v885_v16, %s5455_s17 }
 0x2e8   : > { %v887_v14 = vpop.permute.xlu0 %886  ;;  %v893_v13 = vpop.permute.xlu1 %892 }
 0x2e9   : > { %v888_v12 = vsel %vm882_vm7, %v887_v14, %v6251_v3  ;;  %v894_v28 = vsel %vm882_vm7, %v893_v13, %v6255_v53 }
 0x2ea   : > { %909 = vrot.lane.b32.xlu1 %v888_v12, %s5455_s17  ;;  %911 = vrot.lane.b32.xlu0 %v891_v15, %s5455_s17 }
 0x2ec   : > { %v896_v29 = vpop.permute.xlu0 %895  ;;  %v899_v30 = vpop.permute.xlu1 %898 }
 0x2ed   : > { %v897_v31 = vsel %vm882_vm7, %v896_v29, %v6257_v54  ;;  %v900_v32 = vsel %vm882_vm7, %v899_v30, %v6259_v55 }
 0x2ee   : > { %913 = vrot.lane.b32.xlu1 %v894_v28, %s5455_s17  ;;  %915 = vrot.lane.b32.xlu0 %v897_v31, %s5455_s17 }
 0x2f0   : > { %v902_v33 = vpop.permute.xlu0 %901  ;;  %v905_v34 = vpop.permute.xlu1 %904 }
 0x2f1   : > { %v903_v35 = vsel %vm882_vm7, %v902_v33, %v6261_v56  ;;  %v906_v44 = vsel %vm882_vm7, %v905_v34, %v6263_v57 }
 0x2f2   : > { %917 = vrot.lane.b32.xlu1 %v900_v32, %s5455_s17  ;;  %919 = vrot.lane.b32.xlu0 %v903_v35, %s5455_s17 }
 0x2f6   : > { %921 = vrot.lane.b32.xlu1 %v906_v44, %s5455_s17  ;;  %934 = vperm.xlu0 %3916, %v6249_v24  }
 0x2fa   : > { %939 = vperm.xlu1 %3917, %v6251_v3   ;;  %949 = vperm.xlu0 %3916, %v6255_v53  }
 0x2fe   : > { %944 = vperm.xlu1 %3917, %v6253_v52   ;;  %959 = vperm.xlu0 %3916, %v6259_v55  }
 0x302   : > { %954 = vperm.xlu1 %3917, %v6257_v54   ;;  %969 = vperm.xlu0 %3916, %v6263_v57  }
 0x306   : > { %964 = vperm.xlu1 %3917, %v6261_v56  }
 0x358   : > { %v908_v45 = vpop.permute.xlu0 %907 }
 0x359   : > { %v923_v46 = vsel %vm882_vm7, %v908_v45, %v6249_v24 }
 0x35a   : > { %980 = vrot.lane.b32.xlu1 %v923_v46, %s5457_s12 }
 0x35c   : > { %v910_v47 = vpop.permute.xlu1 %909  ;;  %v912_v48 = vpop.permute.xlu0 %911 }
 0x35d   : > { %v924_v49 = vsel %vm882_vm7, %v910_v47, %v6251_v3  ;;  %v925_v50 = vsel %vm882_vm7, %v912_v48, %v6253_v52 }
 0x35e   : > { %982 = vrot.lane.b32.xlu0 %v924_v49, %s5457_s12  ;;  %984 = vrot.lane.b32.xlu1 %v925_v50, %s5457_s12 }
 0x360   : > { %v914_v51 = vpop.permute.xlu1 %913  ;;  %v916_v36 = vpop.permute.xlu0 %915 }
 0x361   : > { %v926_v37 = vsel %vm882_vm7, %v914_v51, %v6255_v53  ;;  %v927_v25 = vsel %vm882_vm7, %v916_v36, %v6257_v54 }
 0x362   : > { %986 = vrot.lane.b32.xlu0 %v926_v37, %s5457_s12  ;;  %988 = vrot.lane.b32.xlu1 %v927_v25, %s5457_s12 }
 0x364   : > { %v918_v26 = vpop.permute.xlu1 %917  ;;  %v920_v27 = vpop.permute.xlu0 %919 }
 0x365   : > { %v928_v38 = vsel %vm882_vm7, %v918_v26, %v6259_v55  ;;  %v929_v39 = vsel %vm882_vm7, %v920_v27, %v6261_v56 }
 0x366   : > { %990 = vrot.lane.b32.xlu0 %v928_v38, %s5457_s12  ;;  %992 = vrot.lane.b32.xlu1 %v929_v39, %s5457_s12 }
 0x368   : > { %v922_v40 = vpop.permute.xlu1 %921 }
 0x369   : > { %v930_v41 = vsel %vm882_vm7, %v922_v40, %v6263_v57 }
 0x36a   : > { %994 = vrot.lane.b32.xlu0 %v930_v41, %s5457_s12 }
 0x375   : > { %v935_v43 = vpop.permute.xlu0 %934 }
 0x379   : > { %v940_v42 = vpop.permute.xlu1 %939  ;;  %v950_v61 = vpop.permute.xlu0 %949 }
 0x37d   : > { %v945_v60 = vpop.permute.xlu1 %944  ;;  %v960_v7 = vpop.permute.xlu0 %959 }
 0x381   : > { %v955_v5 = vpop.permute.xlu1 %954  ;;  %v970_v11 = vpop.permute.xlu0 %969 }
 0x385   : > { %v965_v9 = vpop.permute.xlu1 %964 }
 0x3cc   : > { %v981_v62 = vpop.permute.xlu1 %980 }
 0x3cd   : > { %v1004_v12 = vsel %vm931_vm8, %v935_v43, %v981_v62  }
 0x3d0   : > { %v985_v63 = vpop.permute.xlu1 %984  ;;  %v983_v0 = vpop.permute.xlu0 %982 }
 0x3d1   : > { %v1006_v14 = vsel %vm931_vm8, %v945_v60, %v985_v63   ;;  %v1005_v13 = vsel %vm931_vm8, %v940_v42, %v983_v0  }
 0x3d4   : > { %v989_v20 = vpop.permute.xlu1 %988  ;;  %v987_v21 = vpop.permute.xlu0 %986 }
 0x3d5   : > { %v1008_v16 = vsel %vm931_vm8, %v955_v5, %v989_v20   ;;  %v1007_v15 = vsel %vm931_vm8, %v950_v61, %v987_v21  }
 0x3d8   : > { %v993_v22 = vpop.permute.xlu1 %992  ;;  %v991_v23 = vpop.permute.xlu0 %990 }
 0x3d9   : > { %v1010_v18 = vsel %vm931_vm8, %v965_v9, %v993_v22   ;;  %v1009_v17 = vsel %vm931_vm8, %v960_v7, %v991_v23  }
 0x3dc   : > { %v995_v4 = vpop.permute.xlu0 %994 }
 0x3dd   : > { %v1011_v19 = vsel %vm931_vm8, %v970_v11, %v995_v4  }
 0x3de PF: > { %v7661_v21 = vmov %v5002_v19  ;;  %v7662_v22 = vmov %v5006_v18  ;;  %v7663_v23 = vmov %v5010_v17  ;;  %v7664_v4 = vmov %v5014_v16  ;;  %v5030_v12 = vphi %v4998_v12, %v1004_v12   ;;  %v5026_v13 = vphi %v4994_v13, %v1005_v13   ;;  %v5022_v14 = vphi %v4990_v14, %v1006_v14   ;;  %v5018_v15 = vphi %v4986_v15, %v1007_v15   ;;  %v5014_v16 = vphi %v4982_v16, %v1008_v16   ;;  %v5010_v17 = vphi %v4978_v17, %v1009_v17   ;;  %v5006_v18 = vphi %v4974_v18, %v1010_v18   ;;  %v5002_v19 = vphi %v4970_v19, %v1011_v19  }
 0x3df   : > { %v7665_v6 = vmov %v5018_v15  ;;  %v7666_v8 = vmov %v5022_v14  ;;  %v7667_v10 = vmov %v5026_v13  ;;  %v7668_v1 = vmov %v5030_v12 }
 0x3e0 PF: > { %1030 = sbr.rel (%p6390_p4) target bundleno = 1357 (0x54d), region = 136  ;;  %s5458_s6 = smov (!%p6390_p4), 16   ;;  %v5459_v19 = vmov (!%p6390_p4), 15   ;;  %vm1031_vm9 = vcmask (!%p6390_p4), 1047680   ;;  %vm1080_vm10 = vcmp.ge.s32.totalorder (!%p6390_p4), %v5622_v2, 14  ;;  %v5062_v1 = vphi %v6408_v1, %v7668_v1   ;;  %v5058_v10 = vphi %v6406_v10, %v7667_v10   ;;  %v5054_v8 = vphi %v6404_v8, %v7666_v8   ;;  %v5050_v6 = vphi %v6402_v6, %v7665_v6   ;;  %v5046_v4 = vphi %v6400_v4, %v7664_v4   ;;  %v5042_v23 = vphi %v6398_v23, %v7663_v23   ;;  %v5038_v22 = vphi %v6396_v22, %v7662_v22   ;;  %v5034_v21 = vphi %v6394_v21, %v7661_v21  }
 0x3e1   : > { %1032 = vrot.lane.b32.xlu0 (!%p6390_p4), %v6249_v24, %s5458_s6  ;;  %1038 = vrot.lane.b32.xlu1 (!%p6390_p4), %v6253_v52, %s5458_s6  ;;  %s5460_s10 = smov (!%p6390_p4), 126  }
 0x3e2   : > { %3919 = vset.pattern.permute.xlu1 (!%p6390_p4), %v5459_v19  ;;  %3918 = vset.pattern.permute.xlu0 (!%p6390_p4), %v5459_v19 }
 0x3e5   : > { %1035 = vrot.lane.b32.xlu0 (!%p6390_p4), %v6251_v3, %s5458_s6  ;;  %1041 = vrot.lane.b32.xlu1 (!%p6390_p4), %v6255_v53, %s5458_s6 }
 0x3e9   : > { %1044 = vrot.lane.b32.xlu0 %v6257_v54, %s5458_s6  ;;  %1047 = vrot.lane.b32.xlu1 %v6259_v55, %s5458_s6 }
 0x3ed   : > { %1050 = vrot.lane.b32.xlu0 %v6261_v56, %s5458_s6  ;;  %1053 = vrot.lane.b32.xlu1 %v6263_v57, %s5458_s6 }
 0x453   : > { %v1033_v6 = vpop.permute.xlu0 %1032  ;;  %v1039_v8 = vpop.permute.xlu1 %1038 }
 0x454   : > { %v1034_v10 = vsel %vm1031_vm9, %v1033_v6, %v6249_v24  ;;  %v1040_v1 = vsel %vm1031_vm9, %v1039_v8, %v6253_v52 }
 0x455   : > { %1056 = vrot.lane.b32.xlu0 %v1034_v10, %s5458_s6 }
 0x457   : > { %v1036_v58 = vpop.permute.xlu0 %1035  ;;  %v1042_v59 = vpop.permute.xlu1 %1041 }
 0x458   : > { %v1037_v18 = vsel %vm1031_vm9, %v1036_v58, %v6251_v3  ;;  %v1043_v17 = vsel %vm1031_vm9, %v1042_v59, %v6255_v53 }
 0x459   : > { %1058 = vrot.lane.b32.xlu1 %v1037_v18, %s5458_s6  ;;  %1060 = vrot.lane.b32.xlu0 %v1040_v1, %s5458_s6 }
 0x45b   : > { %v1045_v16 = vpop.permute.xlu0 %1044  ;;  %v1048_v15 = vpop.permute.xlu1 %1047 }
 0x45c   : > { %v1046_v14 = vsel %vm1031_vm9, %v1045_v16, %v6257_v54  ;;  %v1049_v13 = vsel %vm1031_vm9, %v1048_v15, %v6259_v55 }
 0x45d   : > { %1062 = vrot.lane.b32.xlu1 %v1043_v17, %s5458_s6  ;;  %1064 = vrot.lane.b32.xlu0 %v1046_v14, %s5458_s6 }
 0x45f   : > { %v1051_v12 = vpop.permute.xlu0 %1050  ;;  %v1054_v28 = vpop.permute.xlu1 %1053 }
 0x460   : > { %v1052_v29 = vsel %vm1031_vm9, %v1051_v12, %v6261_v56  ;;  %v1055_v30 = vsel %vm1031_vm9, %v1054_v28, %v6263_v57 }
 0x461   : > { %1066 = vrot.lane.b32.xlu1 %v1049_v13, %s5458_s6  ;;  %1068 = vrot.lane.b32.xlu0 %v1052_v29, %s5458_s6 }
 0x465   : > { %1070 = vrot.lane.b32.xlu1 %v1055_v30, %s5458_s6  ;;  %1083 = vperm.xlu0 %3918, %v6249_v24  }
 0x469   : > { %1088 = vperm.xlu1 %3919, %v6251_v3   ;;  %1098 = vperm.xlu0 %3918, %v6255_v53  }
 0x46d   : > { %1093 = vperm.xlu1 %3919, %v6253_v52   ;;  %1108 = vperm.xlu0 %3918, %v6259_v55  }
 0x471   : > { %1103 = vperm.xlu1 %3919, %v6257_v54   ;;  %1118 = vperm.xlu0 %3918, %v6263_v57  }
 0x475   : > { %1113 = vperm.xlu1 %3919, %v6261_v56  }
 0x4c7   : > { %v1057_v31 = vpop.permute.xlu0 %1056 }
 0x4c8   : > { %v1072_v32 = vsel %vm1031_vm9, %v1057_v31, %v6249_v24 }
 0x4c9   : > { %1129 = vrot.lane.b32.xlu1 %v1072_v32, %s5460_s10 }
 0x4cb   : > { %v1059_v33 = vpop.permute.xlu1 %1058  ;;  %v1061_v34 = vpop.permute.xlu0 %1060 }
 0x4cc   : > { %v1073_v35 = vsel %vm1031_vm9, %v1059_v33, %v6251_v3  ;;  %v1074_v44 = vsel %vm1031_vm9, %v1061_v34, %v6253_v52 }
 0x4cd   : > { %1131 = vrot.lane.b32.xlu0 %v1073_v35, %s5460_s10  ;;  %1133 = vrot.lane.b32.xlu1 %v1074_v44, %s5460_s10 }
 0x4cf   : > { %v1063_v45 = vpop.permute.xlu1 %1062  ;;  %v1065_v46 = vpop.permute.xlu0 %1064 }
 0x4d0   : > { %v1075_v47 = vsel %vm1031_vm9, %v1063_v45, %v6255_v53  ;;  %v1076_v48 = vsel %vm1031_vm9, %v1065_v46, %v6257_v54 }
 0x4d1   : > { %1135 = vrot.lane.b32.xlu0 %v1075_v47, %s5460_s10  ;;  %1137 = vrot.lane.b32.xlu1 %v1076_v48, %s5460_s10 }
 0x4d3   : > { %v1067_v49 = vpop.permute.xlu1 %1066  ;;  %v1069_v50 = vpop.permute.xlu0 %1068 }
 0x4d4   : > { %v1077_v51 = vsel %vm1031_vm9, %v1067_v49, %v6259_v55  ;;  %v1078_v36 = vsel %vm1031_vm9, %v1069_v50, %v6261_v56 }
 0x4d5   : > { %1139 = vrot.lane.b32.xlu0 %v1077_v51, %s5460_s10  ;;  %1141 = vrot.lane.b32.xlu1 %v1078_v36, %s5460_s10 }
 0x4d7   : > { %v1071_v37 = vpop.permute.xlu1 %1070 }
 0x4d8   : > { %v1079_v25 = vsel %vm1031_vm9, %v1071_v37, %v6263_v57 }
 0x4d9   : > { %1143 = vrot.lane.b32.xlu0 %v1079_v25, %s5460_s10 }
 0x4e4   : > { %v1084_v27 = vpop.permute.xlu0 %1083 }
 0x4e8   : > { %v1089_v26 = vpop.permute.xlu1 %1088  ;;  %v1099_v39 = vpop.permute.xlu0 %1098 }
 0x4ec   : > { %v1094_v38 = vpop.permute.xlu1 %1093  ;;  %v1109_v41 = vpop.permute.xlu0 %1108 }
 0x4f0   : > { %v1104_v40 = vpop.permute.xlu1 %1103  ;;  %v1119_v43 = vpop.permute.xlu0 %1118 }
 0x4f4   : > { %v1114_v42 = vpop.permute.xlu1 %1113 }
 0x53b   : > { %v1130_v60 = vpop.permute.xlu1 %1129 }
 0x53c   : > { %v1153_v1 = vsel %vm1080_vm10, %v1084_v27, %v1130_v60  }
 0x53f   : > { %v1134_v61 = vpop.permute.xlu1 %1133  ;;  %v1132_v5 = vpop.permute.xlu0 %1131 }
 0x540   : > { %v1155_v8 = vsel %vm1080_vm10, %v1094_v38, %v1134_v61   ;;  %v1154_v10 = vsel %vm1080_vm10, %v1089_v26, %v1132_v5  }
 0x543   : > { %v1138_v7 = vpop.permute.xlu1 %1137  ;;  %v1136_v9 = vpop.permute.xlu0 %1135 }
 0x544   : > { %v1157_v4 = vsel %vm1080_vm10, %v1104_v40, %v1138_v7   ;;  %v1156_v6 = vsel %vm1080_vm10, %v1099_v39, %v1136_v9  }
 0x547   : > { %v1142_v11 = vpop.permute.xlu1 %1141  ;;  %v1140_v62 = vpop.permute.xlu0 %1139 }
 0x548   : > { %v1159_v22 = vsel %vm1080_vm10, %v1114_v42, %v1142_v11   ;;  %v1158_v23 = vsel %vm1080_vm10, %v1109_v41, %v1140_v62  }
 0x54b   : > { %v1144_v63 = vpop.permute.xlu0 %1143 }
 0x54c   : > { %v1160_v21 = vsel %vm1080_vm10, %v1119_v43, %v1144_v63  }
 0x54d PF: > { %v7669_v5 = vmov %v5066_v21  ;;  %v7670_v7 = vmov %v5070_v22  ;;  %v7671_v9 = vmov %v5074_v23  ;;  %v7672_v11 = vmov %v5078_v4  ;;  %v5094_v1 = vphi %v5062_v1, %v1153_v1   ;;  %v5090_v10 = vphi %v5058_v10, %v1154_v10   ;;  %v5086_v8 = vphi %v5054_v8, %v1155_v8   ;;  %v5082_v6 = vphi %v5050_v6, %v1156_v6   ;;  %v5078_v4 = vphi %v5046_v4, %v1157_v4   ;;  %v5074_v23 = vphi %v5042_v23, %v1158_v23   ;;  %v5070_v22 = vphi %v5038_v22, %v1159_v22   ;;  %v5066_v21 = vphi %v5034_v21, %v1160_v21  }
 0x54e   : > { %v7673_v62 = vmov %v5082_v6  ;;  %v7674_v63 = vmov %v5086_v8  ;;  %v7675_v0 = vmov %v5090_v10  ;;  %v7676_v20 = vmov %v5094_v1 }
 0x54f PF: > { %1179 = sbr.rel (%p6369_p10) target bundleno = 1724 (0x6bc), region = 140  ;;  %s5461_s9 = smov (!%p6369_p10), 16   ;;  %v5462_v21 = vmov (!%p6369_p10), 15   ;;  %vm1180_vm11 = vcmask (!%p6369_p10), 1047680   ;;  %vm1229_vm12 = vcmp.ge.s32.totalorder (!%p6369_p10), %v5622_v2, 15  ;;  %v5126_v20 = vphi %v6387_v20, %v7676_v20   ;;  %v5122_v0 = vphi %v6385_v0, %v7675_v0   ;;  %v5118_v63 = vphi %v6383_v63, %v7674_v63   ;;  %v5114_v62 = vphi %v6381_v62, %v7673_v62   ;;  %v5110_v11 = vphi %v6379_v11, %v7672_v11   ;;  %v5106_v9 = vphi %v6377_v9, %v7671_v9   ;;  %v5102_v7 = vphi %v6375_v7, %v7670_v7   ;;  %v5098_v5 = vphi %v6373_v5, %v7669_v5  }
 0x550   : > { %1181 = vrot.lane.b32.xlu0 (!%p6369_p10), %v6249_v24, %s5461_s9  ;;  %1187 = vrot.lane.b32.xlu1 (!%p6369_p10), %v6253_v52, %s5461_s9  ;;  %s5463_s13 = smov (!%p6369_p10), 127  }
 0x551   : > { %3921 = vset.pattern.permute.xlu1 (!%p6369_p10), %v5462_v21  ;;  %3920 = vset.pattern.permute.xlu0 (!%p6369_p10), %v5462_v21 }
 0x554   : > { %1184 = vrot.lane.b32.xlu0 (!%p6369_p10), %v6251_v3, %s5461_s9  ;;  %1190 = vrot.lane.b32.xlu1 (!%p6369_p10), %v6255_v53, %s5461_s9 }
 0x558   : > { %1193 = vrot.lane.b32.xlu0 %v6257_v54, %s5461_s9  ;;  %1196 = vrot.lane.b32.xlu1 %v6259_v55, %s5461_s9 }
 0x55c   : > { %1199 = vrot.lane.b32.xlu0 %v6261_v56, %s5461_s9  ;;  %1202 = vrot.lane.b32.xlu1 %v6263_v57, %s5461_s9 }
 0x5c2   : > { %v1182_v0 = vpop.permute.xlu0 %1181  ;;  %v1188_v20 = vpop.permute.xlu1 %1187 }
 0x5c3   : > { %v1183_v22 = vsel %vm1180_vm11, %v1182_v0, %v6249_v24  ;;  %v1189_v23 = vsel %vm1180_vm11, %v1188_v20, %v6253_v52 }
 0x5c4   : > { %1205 = vrot.lane.b32.xlu0 %v1183_v22, %s5461_s9 }
 0x5c6   : > { %v1185_v4 = vpop.permute.xlu0 %1184  ;;  %v1191_v19 = vpop.permute.xlu1 %1190 }
 0x5c7   : > { %v1186_v6 = vsel %vm1180_vm11, %v1185_v4, %v6251_v3  ;;  %v1192_v8 = vsel %vm1180_vm11, %v1191_v19, %v6255_v53 }
 0x5c8   : > { %1207 = vrot.lane.b32.xlu1 %v1186_v6, %s5461_s9  ;;  %1209 = vrot.lane.b32.xlu0 %v1189_v23, %s5461_s9 }
 0x5ca   : > { %v1194_v10 = vpop.permute.xlu0 %1193  ;;  %v1197_v1 = vpop.permute.xlu1 %1196 }
 0x5cb   : > { %v1195_v58 = vsel %vm1180_vm11, %v1194_v10, %v6257_v54  ;;  %v1198_v59 = vsel %vm1180_vm11, %v1197_v1, %v6259_v55 }
 0x5cc   : > { %1211 = vrot.lane.b32.xlu1 %v1192_v8, %s5461_s9  ;;  %1213 = vrot.lane.b32.xlu0 %v1195_v58, %s5461_s9 }
 0x5ce   : > { %v1200_v18 = vpop.permute.xlu0 %1199  ;;  %v1203_v17 = vpop.permute.xlu1 %1202 }
 0x5cf   : > { %v1201_v16 = vsel %vm1180_vm11, %v1200_v18, %v6261_v56  ;;  %v1204_v15 = vsel %vm1180_vm11, %v1203_v17, %v6263_v57 }
 0x5d0   : > { %1215 = vrot.lane.b32.xlu1 %v1198_v59, %s5461_s9  ;;  %1217 = vrot.lane.b32.xlu0 %v1201_v16, %s5461_s9 }
 0x5d4   : > { %1219 = vrot.lane.b32.xlu1 %v1204_v15, %s5461_s9  ;;  %1232 = vperm.xlu0 %3920, %v6249_v24  }
 0x5d8   : > { %1237 = vperm.xlu1 %3921, %v6251_v3   ;;  %1247 = vperm.xlu0 %3920, %v6255_v53  }
 0x5dc   : > { %1242 = vperm.xlu1 %3921, %v6253_v52   ;;  %1257 = vperm.xlu0 %3920, %v6259_v55  }
 0x5e0   : > { %1252 = vperm.xlu1 %3921, %v6257_v54   ;;  %1267 = vperm.xlu0 %3920, %v6263_v57  }
 0x5e4   : > { %1262 = vperm.xlu1 %3921, %v6261_v56  }
 0x636   : > { %v1206_v14 = vpop.permute.xlu0 %1205 }
 0x637   : > { %v1221_v13 = vsel %vm1180_vm11, %v1206_v14, %v6249_v24 }
 0x638   : > { %1278 = vrot.lane.b32.xlu1 %v1221_v13, %s5463_s13 }
 0x63a   : > { %v1208_v12 = vpop.permute.xlu1 %1207  ;;  %v1210_v28 = vpop.permute.xlu0 %1209 }
 0x63b   : > { %v1222_v29 = vsel %vm1180_vm11, %v1208_v12, %v6251_v3  ;;  %v1223_v30 = vsel %vm1180_vm11, %v1210_v28, %v6253_v52 }
 0x63c   : > { %1280 = vrot.lane.b32.xlu0 %v1222_v29, %s5463_s13  ;;  %1282 = vrot.lane.b32.xlu1 %v1223_v30, %s5463_s13 }
 0x63e   : > { %v1212_v31 = vpop.permute.xlu1 %1211  ;;  %v1214_v32 = vpop.permute.xlu0 %1213 }
 0x63f   : > { %v1224_v33 = vsel %vm1180_vm11, %v1212_v31, %v6255_v53  ;;  %v1225_v34 = vsel %vm1180_vm11, %v1214_v32, %v6257_v54 }
 0x640   : > { %1284 = vrot.lane.b32.xlu0 %v1224_v33, %s5463_s13  ;;  %1286 = vrot.lane.b32.xlu1 %v1225_v34, %s5463_s13 }
 0x642   : > { %v1216_v35 = vpop.permute.xlu1 %1215  ;;  %v1218_v44 = vpop.permute.xlu0 %1217 }
 0x643   : > { %v1226_v45 = vsel %vm1180_vm11, %v1216_v35, %v6259_v55  ;;  %v1227_v46 = vsel %vm1180_vm11, %v1218_v44, %v6261_v56 }
 0x644   : > { %1288 = vrot.lane.b32.xlu0 %v1226_v45, %s5463_s13  ;;  %1290 = vrot.lane.b32.xlu1 %v1227_v46, %s5463_s13 }
 0x646   : > { %v1220_v47 = vpop.permute.xlu1 %1219 }
 0x647   : > { %v1228_v48 = vsel %vm1180_vm11, %v1220_v47, %v6263_v57 }
 0x648   : > { %1292 = vrot.lane.b32.xlu0 %v1228_v48, %s5463_s13 }
 0x653   : > { %v1233_v50 = vpop.permute.xlu0 %1232 }
 0x657   : > { %v1238_v49 = vpop.permute.xlu1 %1237  ;;  %v1248_v36 = vpop.permute.xlu0 %1247 }
 0x65b   : > { %v1243_v51 = vpop.permute.xlu1 %1242  ;;  %v1258_v25 = vpop.permute.xlu0 %1257 }
 0x65f   : > { %v1253_v37 = vpop.permute.xlu1 %1252  ;;  %v1268_v27 = vpop.permute.xlu0 %1267 }
 0x663   : > { %v1263_v26 = vpop.permute.xlu1 %1262 }
 0x6aa   : > { %v1279_v38 = vpop.permute.xlu1 %1278 }
 0x6ab   : > { %v1302_v20 = vsel %vm1229_vm12, %v1233_v50, %v1279_v38  }
 0x6ae   : > { %v1283_v39 = vpop.permute.xlu1 %1282  ;;  %v1281_v40 = vpop.permute.xlu0 %1280 }
 0x6af   : > { %v1304_v63 = vsel %vm1229_vm12, %v1243_v51, %v1283_v39   ;;  %v1303_v0 = vsel %vm1229_vm12, %v1238_v49, %v1281_v40  }
 0x6b2   : > { %v1287_v41 = vpop.permute.xlu1 %1286  ;;  %v1285_v42 = vpop.permute.xlu0 %1284 }
 0x6b3   : > { %v1306_v11 = vsel %vm1229_vm12, %v1253_v37, %v1287_v41   ;;  %v1305_v62 = vsel %vm1229_vm12, %v1248_v36, %v1285_v42  }
 0x6b6   : > { %v1291_v43 = vpop.permute.xlu1 %1290  ;;  %v1289_v60 = vpop.permute.xlu0 %1288 }
 0x6b7   : > { %v1308_v7 = vsel %vm1229_vm12, %v1263_v26, %v1291_v43   ;;  %v1307_v9 = vsel %vm1229_vm12, %v1258_v25, %v1289_v60  }
 0x6ba   : > { %v1293_v61 = vpop.permute.xlu0 %1292 }
 0x6bb   : > { %v1309_v5 = vsel %vm1229_vm12, %v1268_v27, %v1293_v61  }
 0x6bc PF: > { %v7677_v38 = vmov %v5130_v5  ;;  %v7678_v39 = vmov %v5134_v7  ;;  %v7679_v40 = vmov %v5138_v9  ;;  %v7680_v41 = vmov %v5142_v11  ;;  %v5158_v20 = vphi %v5126_v20, %v1302_v20   ;;  %v5154_v0 = vphi %v5122_v0, %v1303_v0   ;;  %v5150_v63 = vphi %v5118_v63, %v1304_v63   ;;  %v5146_v62 = vphi %v5114_v62, %v1305_v62   ;;  %v5142_v11 = vphi %v5110_v11, %v1306_v11   ;;  %v5138_v9 = vphi %v5106_v9, %v1307_v9   ;;  %v5134_v7 = vphi %v5102_v7, %v1308_v7   ;;  %v5130_v5 = vphi %v5098_v5, %v1309_v5  }
 0x6bd   : > { %v7681_v42 = vmov %v5146_v62  ;;  %v7682_v43 = vmov %v5150_v63  ;;  %v7683_v60 = vmov %v5154_v0  ;;  %v7684_v61 = vmov %v5158_v20 }
 0x6be PF: > { %s2391_s29 = scalar_select %p6346_p8, 1, 0  ;;  %v5190_v61 = vphi %v6364_v61, %v7684_v61   ;;  %v5186_v60 = vphi %v6362_v60, %v7683_v60   ;;  %v5182_v43 = vphi %v6360_v43, %v7682_v43   ;;  %v5178_v42 = vphi %v6358_v42, %v7681_v42   ;;  %v5174_v41 = vphi %v6356_v41, %v7680_v41   ;;  %v5170_v40 = vphi %v6354_v40, %v7679_v40   ;;  %v5166_v39 = vphi %v6352_v39, %v7678_v39   ;;  %v5162_v38 = vphi %v6350_v38, %v7677_v38  }
 0x6c0   : > { %v2392_v5 = vstv %s2391_s29 }
 0x6c1   : > { %vm2393_vm13 = vcmp.ne.s32.totalorder %v2392_v5, 0 }
 0x6c2   : > { %v2394_v27 = vsel %vm2393_vm13, %v6249_v24, %v5190_v61   ;;  %v2398_v26 = vsel %vm2393_vm13, %v6251_v3, %v5186_v60   ;;  %v2402_v25 = vsel %vm2393_vm13, %v6253_v52, %v5182_v43   ;;  %v2406_v37 = vsel %vm2393_vm13, %v6255_v53, %v5178_v42  }
 0x6c3   : > { %v2410_v36 = vsel %vm2393_vm13, %v6257_v54, %v5174_v41   ;;  %v2414_v51 = vsel %vm2393_vm13, %v6259_v55, %v5170_v40   ;;  %v2418_v50 = vsel %vm2393_vm13, %v6261_v56, %v5166_v39   ;;  %v2422_v49 = vsel %vm2393_vm13, %v6263_v57, %v5162_v38  }
 0x6c4 PF: > { %1347 = sbr.rel (%p6325_p5) target bundleno = 2097 (0x831), region = 148  ;;  %s5464_s11 = smov (!%p6325_p5), 16   ;;  %v5465_v7 = vmov (!%p6325_p5), 0   ;;  %vm1348_vm14 = vcmask (!%p6325_p5), 1047680   ;;  %vm1397_vm15 = vcmp.lt.s32.totalorder (!%p6325_p5), %v5622_v2, 1  ;;  %v5222_v27 = vphi %v6343_v27, %v2394_v27   ;;  %v5218_v26 = vphi %v6341_v26, %v2398_v26   ;;  %v5214_v25 = vphi %v6339_v25, %v2402_v25   ;;  %v5210_v37 = vphi %v6337_v37, %v2406_v37   ;;  %v5206_v36 = vphi %v6335_v36, %v2410_v36   ;;  %v5202_v51 = vphi %v6333_v51, %v2414_v51   ;;  %v5198_v50 = vphi %v6331_v50, %v2418_v50   ;;  %v5194_v49 = vphi %v6329_v49, %v2422_v49  }
 0x6c5   : > { %1349 = vrot.lane.b32.xlu0 (!%p6325_p5), %v6249_v24, %s5464_s11  ;;  %1355 = vrot.lane.b32.xlu1 (!%p6325_p5), %v6253_v52, %s5464_s11  ;;  %s5466_s14 = smov (!%p6325_p5), 113  }
 0x6c6   : > { %3923 = vset.pattern.permute.xlu1 (!%p6325_p5), %v5465_v7  ;;  %3922 = vset.pattern.permute.xlu0 (!%p6325_p5), %v5465_v7 }
 0x6c9   : > { %1352 = vrot.lane.b32.xlu0 (!%p6325_p5), %v6251_v3, %s5464_s11  ;;  %1358 = vrot.lane.b32.xlu1 (!%p6325_p5), %v6255_v53, %s5464_s11 }
 0x6cd   : > { %1361 = vrot.lane.b32.xlu0 %v6257_v54, %s5464_s11  ;;  %1364 = vrot.lane.b32.xlu1 %v6259_v55, %s5464_s11 }
 0x6d1   : > { %1367 = vrot.lane.b32.xlu0 %v6261_v56, %s5464_s11  ;;  %1370 = vrot.lane.b32.xlu1 %v6263_v57, %s5464_s11 }
 0x737   : > { %v1350_v9 = vpop.permute.xlu0 %1349  ;;  %v1356_v11 = vpop.permute.xlu1 %1355 }
 0x738   : > { %v1351_v62 = vsel %vm1348_vm14, %v1350_v9, %v6249_v24  ;;  %v1357_v63 = vsel %vm1348_vm14, %v1356_v11, %v6253_v52 }
 0x739   : > { %1373 = vrot.lane.b32.xlu0 %v1351_v62, %s5464_s11 }
 0x73b   : > { %v1353_v21 = vpop.permute.xlu0 %1352  ;;  %v1359_v0 = vpop.permute.xlu1 %1358 }
 0x73c   : > { %v1354_v20 = vsel %vm1348_vm14, %v1353_v21, %v6251_v3  ;;  %v1360_v22 = vsel %vm1348_vm14, %v1359_v0, %v6255_v53 }
 0x73d   : > { %1375 = vrot.lane.b32.xlu1 %v1354_v20, %s5464_s11  ;;  %1377 = vrot.lane.b32.xlu0 %v1357_v63, %s5464_s11 }
 0x73f   : > { %v1362_v23 = vpop.permute.xlu0 %1361  ;;  %v1365_v4 = vpop.permute.xlu1 %1364 }
 0x740   : > { %v1363_v19 = vsel %vm1348_vm14, %v1362_v23, %v6257_v54  ;;  %v1366_v6 = vsel %vm1348_vm14, %v1365_v4, %v6259_v55 }
 0x741   : > { %1379 = vrot.lane.b32.xlu1 %v1360_v22, %s5464_s11  ;;  %1381 = vrot.lane.b32.xlu0 %v1363_v19, %s5464_s11 }
 0x743   : > { %v1368_v8 = vpop.permute.xlu0 %1367  ;;  %v1371_v10 = vpop.permute.xlu1 %1370 }
 0x744   : > { %v1369_v1 = vsel %vm1348_vm14, %v1368_v8, %v6261_v56  ;;  %v1372_v58 = vsel %vm1348_vm14, %v1371_v10, %v6263_v57 }
 0x745   : > { %1383 = vrot.lane.b32.xlu1 %v1366_v6, %s5464_s11  ;;  %1385 = vrot.lane.b32.xlu0 %v1369_v1, %s5464_s11 }
 0x749   : > { %1387 = vrot.lane.b32.xlu1 %v1372_v58, %s5464_s11  ;;  %1400 = vperm.xlu0 %3922, %v6249_v24  }
 0x74d   : > { %1405 = vperm.xlu1 %3923, %v6251_v3   ;;  %1415 = vperm.xlu0 %3922, %v6255_v53  }
 0x751   : > { %1410 = vperm.xlu1 %3923, %v6253_v52   ;;  %1425 = vperm.xlu0 %3922, %v6259_v55  }
 0x755   : > { %1420 = vperm.xlu1 %3923, %v6257_v54   ;;  %1435 = vperm.xlu0 %3922, %v6263_v57  }
 0x759   : > { %1430 = vperm.xlu1 %3923, %v6261_v56  }
 0x7ab   : > { %v1374_v59 = vpop.permute.xlu0 %1373 }
 0x7ac   : > { %v1389_v18 = vsel %vm1348_vm14, %v1374_v59, %v6249_v24 }
 0x7ad   : > { %1446 = vrot.lane.b32.xlu1 %v1389_v18, %s5466_s14 }
 0x7af   : > { %v1376_v17 = vpop.permute.xlu1 %1375  ;;  %v1378_v16 = vpop.permute.xlu0 %1377 }
 0x7b0   : > { %v1390_v15 = vsel %vm1348_vm14, %v1376_v17, %v6251_v3  ;;  %v1391_v14 = vsel %vm1348_vm14, %v1378_v16, %v6253_v52 }
 0x7b1   : > { %1448 = vrot.lane.b32.xlu0 %v1390_v15, %s5466_s14  ;;  %1450 = vrot.lane.b32.xlu1 %v1391_v14, %s5466_s14 }
 0x7b3   : > { %v1380_v13 = vpop.permute.xlu1 %1379  ;;  %v1382_v12 = vpop.permute.xlu0 %1381 }
 0x7b4   : > { %v1392_v28 = vsel %vm1348_vm14, %v1380_v13, %v6255_v53  ;;  %v1393_v29 = vsel %vm1348_vm14, %v1382_v12, %v6257_v54 }
 0x7b5   : > { %1452 = vrot.lane.b32.xlu0 %v1392_v28, %s5466_s14  ;;  %1454 = vrot.lane.b32.xlu1 %v1393_v29, %s5466_s14 }
 0x7b7   : > { %v1384_v30 = vpop.permute.xlu1 %1383  ;;  %v1386_v31 = vpop.permute.xlu0 %1385 }
 0x7b8   : > { %v1394_v32 = vsel %vm1348_vm14, %v1384_v30, %v6259_v55  ;;  %v1395_v33 = vsel %vm1348_vm14, %v1386_v31, %v6261_v56 }
 0x7b9   : > { %1456 = vrot.lane.b32.xlu0 %v1394_v32, %s5466_s14  ;;  %1458 = vrot.lane.b32.xlu1 %v1395_v33, %s5466_s14 }
 0x7bb   : > { %v1388_v34 = vpop.permute.xlu1 %1387 }
 0x7bc   : > { %v1396_v35 = vsel %vm1348_vm14, %v1388_v34, %v6263_v57 }
 0x7bd   : > { %1460 = vrot.lane.b32.xlu0 %v1396_v35, %s5466_s14 }
 0x7c8   : > { %v1401_v45 = vpop.permute.xlu0 %1400 }
 0x7cc   : > { %v1406_v44 = vpop.permute.xlu1 %1405  ;;  %v1416_v47 = vpop.permute.xlu0 %1415 }
 0x7d0   : > { %v1411_v46 = vpop.permute.xlu1 %1410  ;;  %v1426_v49 = vpop.permute.xlu0 %1425 }
 0x7d4   : > { %v1421_v48 = vpop.permute.xlu1 %1420  ;;  %v1436_v51 = vpop.permute.xlu0 %1435 }
 0x7d8   : > { %v1431_v50 = vpop.permute.xlu1 %1430 }
 0x81f   : > { %v1447_v36 = vpop.permute.xlu1 %1446 }
 0x820   : > { %v1470_v27 = vsel %vm1397_vm15, %v1401_v45, %v1447_v36  }
 0x823   : > { %v1451_v37 = vpop.permute.xlu1 %1450  ;;  %v1449_v25 = vpop.permute.xlu0 %1448 }
 0x824   : > { %v1472_v26 = vsel %vm1397_vm15, %v1411_v46, %v1451_v37   ;;  %v1471_v38 = vsel %vm1397_vm15, %v1406_v44, %v1449_v25  }
 0x825   : > { %v7686_v25 = vmov %v1472_v26  ;;  %v7687_v26 = vmov %v1471_v38 }
 0x827   : > { %v1455_v39 = vpop.permute.xlu1 %1454  ;;  %v1453_v40 = vpop.permute.xlu0 %1452 }
 0x828   : > { %v1474_v36 = vsel %vm1397_vm15, %v1421_v48, %v1455_v39   ;;  %v1473_v37 = vsel %vm1397_vm15, %v1416_v47, %v1453_v40  }
 0x82b   : > { %v1459_v41 = vpop.permute.xlu1 %1458  ;;  %v1457_v42 = vpop.permute.xlu0 %1456 }
 0x82c   : > { %v1476_v50 = vsel %vm1397_vm15, %v1431_v50, %v1459_v41   ;;  %v1475_v43 = vsel %vm1397_vm15, %v1426_v49, %v1457_v42  }
 0x82f   : > { %v1461_v60 = vpop.permute.xlu0 %1460 }
 0x830   : > { %v1477_v49 = vsel %vm1397_vm15, %v1436_v51, %v1461_v60   ;;  %v7685_v51 = vmov %v1475_v43 }
 0x831 PF: > { %v7688_v33 = vmov %v5226_v49  ;;  %v7689_v34 = vmov %v5230_v50  ;;  %v7690_v35 = vmov %v5234_v51  ;;  %v7691_v44 = vmov %v5238_v36  ;;  %v5254_v27 = vphi %v5222_v27, %v1470_v27   ;;  %v5250_v26 = vphi %v5218_v26, %v7687_v26   ;;  %v5246_v25 = vphi %v5214_v25, %v7686_v25   ;;  %v5242_v37 = vphi %v5210_v37, %v1473_v37   ;;  %v5238_v36 = vphi %v5206_v36, %v1474_v36   ;;  %v5234_v51 = vphi %v5202_v51, %v7685_v51   ;;  %v5230_v50 = vphi %v5198_v50, %v1476_v50   ;;  %v5226_v49 = vphi %v5194_v49, %v1477_v49  }
 0x832   : > { %v7692_v45 = vmov %v5242_v37  ;;  %v7693_v46 = vmov %v5246_v25  ;;  %v7694_v47 = vmov %v5250_v26  ;;  %v7695_v48 = vmov %v5254_v27 }
 0x833 PF: > { %1496 = sbr.rel (%p6304_p13) target bundleno = 2464 (0x9a0), region = 152  ;;  %s5467_s18 = smov (!%p6304_p13), 16   ;;  %v5468_v27 = vmov (!%p6304_p13), 0   ;;  %vm1497_vm0 = vcmask (!%p6304_p13), 1047680   ;;  %vm1546_vm1 = vcmp.lt.s32.totalorder (!%p6304_p13), %v5622_v2, 2  ;;  %v5286_v48 = vphi %v6322_v48, %v7695_v48   ;;  %v5282_v47 = vphi %v6320_v47, %v7694_v47   ;;  %v5278_v46 = vphi %v6318_v46, %v7693_v46   ;;  %v5274_v45 = vphi %v6316_v45, %v7692_v45   ;;  %v5270_v44 = vphi %v6314_v44, %v7691_v44   ;;  %v5266_v35 = vphi %v6312_v35, %v7690_v35   ;;  %v5262_v34 = vphi %v6310_v34, %v7689_v34   ;;  %v5258_v33 = vphi %v6308_v33, %v7688_v33  }
 0x834   : > { %1498 = vrot.lane.b32.xlu0 (!%p6304_p13), %v6249_v24, %s5467_s18  ;;  %1504 = vrot.lane.b32.xlu1 (!%p6304_p13), %v6253_v52, %s5467_s18  ;;  %s5469_s8 = smov (!%p6304_p13), 114  }
 0x835   : > { %3925 = vset.pattern.permute.xlu1 (!%p6304_p13), %v5468_v27  ;;  %3924 = vset.pattern.permute.xlu0 (!%p6304_p13), %v5468_v27 }
 0x838   : > { %1501 = vrot.lane.b32.xlu0 (!%p6304_p13), %v6251_v3, %s5467_s18  ;;  %1507 = vrot.lane.b32.xlu1 (!%p6304_p13), %v6255_v53, %s5467_s18 }
 0x83c   : > { %1510 = vrot.lane.b32.xlu0 %v6257_v54, %s5467_s18  ;;  %1513 = vrot.lane.b32.xlu1 %v6259_v55, %s5467_s18 }
 0x840   : > { %1516 = vrot.lane.b32.xlu0 %v6261_v56, %s5467_s18  ;;  %1519 = vrot.lane.b32.xlu1 %v6263_v57, %s5467_s18 }
 0x8a6   : > { %v1499_v61 = vpop.permute.xlu0 %1498  ;;  %v1505_v5 = vpop.permute.xlu1 %1504 }
 0x8a7   : > { %v1500_v7 = vsel %vm1497_vm0, %v1499_v61, %v6249_v24  ;;  %v1506_v9 = vsel %vm1497_vm0, %v1505_v5, %v6253_v52 }
 0x8a8   : > { %1522 = vrot.lane.b32.xlu0 %v1500_v7, %s5467_s18 }
 0x8aa   : > { %v1502_v11 = vpop.permute.xlu0 %1501  ;;  %v1508_v62 = vpop.permute.xlu1 %1507 }
 0x8ab   : > { %v1503_v63 = vsel %vm1497_vm0, %v1502_v11, %v6251_v3  ;;  %v1509_v21 = vsel %vm1497_vm0, %v1508_v62, %v6255_v53 }
 0x8ac   : > { %1524 = vrot.lane.b32.xlu1 %v1503_v63, %s5467_s18  ;;  %1526 = vrot.lane.b32.xlu0 %v1506_v9, %s5467_s18 }
 0x8ae   : > { %v1511_v0 = vpop.permute.xlu0 %1510  ;;  %v1514_v20 = vpop.permute.xlu1 %1513 }
 0x8af   : > { %v1512_v22 = vsel %vm1497_vm0, %v1511_v0, %v6257_v54  ;;  %v1515_v23 = vsel %vm1497_vm0, %v1514_v20, %v6259_v55 }
 0x8b0   : > { %1528 = vrot.lane.b32.xlu1 %v1509_v21, %s5467_s18  ;;  %1530 = vrot.lane.b32.xlu0 %v1512_v22, %s5467_s18 }
 0x8b2   : > { %v1517_v4 = vpop.permute.xlu0 %1516  ;;  %v1520_v19 = vpop.permute.xlu1 %1519 }
 0x8b3   : > { %v1518_v6 = vsel %vm1497_vm0, %v1517_v4, %v6261_v56  ;;  %v1521_v8 = vsel %vm1497_vm0, %v1520_v19, %v6263_v57 }
 0x8b4   : > { %1532 = vrot.lane.b32.xlu1 %v1515_v23, %s5467_s18  ;;  %1534 = vrot.lane.b32.xlu0 %v1518_v6, %s5467_s18 }
 0x8b8   : > { %1536 = vrot.lane.b32.xlu1 %v1521_v8, %s5467_s18  ;;  %1549 = vperm.xlu0 %3924, %v6249_v24  }
 0x8bc   : > { %1554 = vperm.xlu1 %3925, %v6251_v3   ;;  %1564 = vperm.xlu0 %3924, %v6255_v53  }
 0x8c0   : > { %1559 = vperm.xlu1 %3925, %v6253_v52   ;;  %1574 = vperm.xlu0 %3924, %v6259_v55  }
 0x8c4   : > { %1569 = vperm.xlu1 %3925, %v6257_v54   ;;  %1584 = vperm.xlu0 %3924, %v6263_v57  }
 0x8c8   : > { %1579 = vperm.xlu1 %3925, %v6261_v56  }
 0x91a   : > { %v1523_v10 = vpop.permute.xlu0 %1522 }
 0x91b   : > { %v1538_v1 = vsel %vm1497_vm0, %v1523_v10, %v6249_v24 }
 0x91c   : > { %1595 = vrot.lane.b32.xlu1 %v1538_v1, %s5469_s8 }
 0x91e   : > { %v1525_v58 = vpop.permute.xlu1 %1524  ;;  %v1527_v59 = vpop.permute.xlu0 %1526 }
 0x91f   : > { %v1539_v18 = vsel %vm1497_vm0, %v1525_v58, %v6251_v3  ;;  %v1540_v17 = vsel %vm1497_vm0, %v1527_v59, %v6253_v52 }
 0x920   : > { %1597 = vrot.lane.b32.xlu0 %v1539_v18, %s5469_s8  ;;  %1599 = vrot.lane.b32.xlu1 %v1540_v17, %s5469_s8 }
 0x922   : > { %v1529_v16 = vpop.permute.xlu1 %1528  ;;  %v1531_v15 = vpop.permute.xlu0 %1530 }
 0x923   : > { %v1541_v14 = vsel %vm1497_vm0, %v1529_v16, %v6255_v53  ;;  %v1542_v13 = vsel %vm1497_vm0, %v1531_v15, %v6257_v54 }
 0x924   : > { %1601 = vrot.lane.b32.xlu0 %v1541_v14, %s5469_s8  ;;  %1603 = vrot.lane.b32.xlu1 %v1542_v13, %s5469_s8 }
 0x926   : > { %v1533_v12 = vpop.permute.xlu1 %1532  ;;  %v1535_v28 = vpop.permute.xlu0 %1534 }
 0x927   : > { %v1543_v29 = vsel %vm1497_vm0, %v1533_v12, %v6259_v55  ;;  %v1544_v30 = vsel %vm1497_vm0, %v1535_v28, %v6261_v56 }
 0x928   : > { %1605 = vrot.lane.b32.xlu0 %v1543_v29, %s5469_s8  ;;  %1607 = vrot.lane.b32.xlu1 %v1544_v30, %s5469_s8 }
 0x92a   : > { %v1537_v31 = vpop.permute.xlu1 %1536 }
 0x92b   : > { %v1545_v32 = vsel %vm1497_vm0, %v1537_v31, %v6263_v57 }
 0x92c   : > { %1609 = vrot.lane.b32.xlu0 %v1545_v32, %s5469_s8 }
 0x937   : > { %v1550_v34 = vpop.permute.xlu0 %1549 }
 0x93b   : > { %v1555_v33 = vpop.permute.xlu1 %1554  ;;  %v1565_v44 = vpop.permute.xlu0 %1564 }
 0x93f   : > { %v1560_v35 = vpop.permute.xlu1 %1559  ;;  %v1575_v46 = vpop.permute.xlu0 %1574 }
 0x943   : > { %v1570_v45 = vpop.permute.xlu1 %1569  ;;  %v1585_v48 = vpop.permute.xlu0 %1584 }
 0x947   : > { %v1580_v47 = vpop.permute.xlu1 %1579 }
 0x98e   : > { %v1596_v49 = vpop.permute.xlu1 %1595 }
 0x98f   : > { %v1619_v50 = vsel %vm1546_vm1, %v1550_v34, %v1596_v49  }
 0x992   : > { %v1600_v51 = vpop.permute.xlu1 %1599  ;;  %v1598_v36 = vpop.permute.xlu0 %1597 }
 0x993   : > { %v1621_v37 = vsel %vm1546_vm1, %v1560_v35, %v1600_v51   ;;  %v1620_v25 = vsel %vm1546_vm1, %v1555_v33, %v1598_v36  }
 0x996   : > { %v1604_v26 = vpop.permute.xlu1 %1603  ;;  %v1602_v38 = vpop.permute.xlu0 %1601 }
 0x997   : > { %v1623_v39 = vsel %vm1546_vm1, %v1570_v45, %v1604_v26   ;;  %v1622_v45 = vsel %vm1546_vm1, %v1565_v44, %v1602_v38  }
 0x998   : > { %v7696_v44 = vmov %v1623_v39 }
 0x99a   : > { %v1608_v40 = vpop.permute.xlu1 %1607  ;;  %v1606_v41 = vpop.permute.xlu0 %1605 }
 0x99b   : > { %v1625_v34 = vsel %vm1546_vm1, %v1580_v47, %v1608_v40   ;;  %v1624_v35 = vsel %vm1546_vm1, %v1575_v46, %v1606_v41   ;;  %v7697_v46 = vmov %v1621_v37  ;;  %v7698_v47 = vmov %v1620_v25 }
 0x99e   : > { %v1610_v42 = vpop.permute.xlu0 %1609 }
 0x99f   : > { %v1626_v33 = vsel %vm1546_vm1, %v1585_v48, %v1610_v42   ;;  %v7699_v48 = vmov %v1619_v50 }
 0x9a0 PF: > { %v7700_v12 = vmov %v5290_v33  ;;  %v7701_v58 = vmov %v5294_v34  ;;  %v7702_v59 = vmov %v5298_v35  ;;  %v7703_v28 = vmov %v5302_v44  ;;  %v5318_v48 = vphi %v5286_v48, %v7699_v48   ;;  %v5314_v47 = vphi %v5282_v47, %v7698_v47   ;;  %v5310_v46 = vphi %v5278_v46, %v7697_v46   ;;  %v5306_v45 = vphi %v5274_v45, %v1622_v45   ;;  %v5302_v44 = vphi %v5270_v44, %v7696_v44   ;;  %v5298_v35 = vphi %v5266_v35, %v1624_v35   ;;  %v5294_v34 = vphi %v5262_v34, %v1625_v34   ;;  %v5290_v33 = vphi %v5258_v33, %v1626_v33  }
 0x9a1   : > { %v7704_v29 = vmov %v5306_v45  ;;  %v7705_v30 = vmov %v5310_v46  ;;  %v7706_v31 = vmov %v5314_v47  ;;  %v7707_v32 = vmov %v5318_v48 }
 0x9a2 PF: > { %1645 = sbr.rel (%p6283_p2) target bundleno = 2831 (0xb0f), region = 156  ;;  %s5470_s25 = smov (!%p6283_p2), 16   ;;  %v5471_v43 = vmov (!%p6283_p2), 0   ;;  %vm1646_vm2 = vcmask (!%p6283_p2), 1047680   ;;  %vm1695_vm3 = vcmp.lt.s32.totalorder (!%p6283_p2), %v5622_v2, 3  ;;  %v5350_v32 = vphi %v6301_v32, %v7707_v32   ;;  %v5346_v31 = vphi %v6299_v31, %v7706_v31   ;;  %v5342_v30 = vphi %v6297_v30, %v7705_v30   ;;  %v5338_v29 = vphi %v6295_v29, %v7704_v29   ;;  %v5334_v28 = vphi %v6293_v28, %v7703_v28   ;;  %v5330_v59 = vphi %v6291_v59, %v7702_v59   ;;  %v5326_v58 = vphi %v6289_v58, %v7701_v58   ;;  %v5322_v12 = vphi %v6287_v12, %v7700_v12  }
 0x9a3   : > { %1647 = vrot.lane.b32.xlu0 (!%p6283_p2), %v6249_v24, %s5470_s25  ;;  %1653 = vrot.lane.b32.xlu1 (!%p6283_p2), %v6253_v52, %s5470_s25  ;;  %s5472_s5 = smov (!%p6283_p2), 115  }
 0x9a4   : > { %3927 = vset.pattern.permute.xlu1 (!%p6283_p2), %v5471_v43  ;;  %3926 = vset.pattern.permute.xlu0 (!%p6283_p2), %v5471_v43 }
 0x9a7   : > { %1650 = vrot.lane.b32.xlu0 (!%p6283_p2), %v6251_v3, %s5470_s25  ;;  %1656 = vrot.lane.b32.xlu1 (!%p6283_p2), %v6255_v53, %s5470_s25 }
 0x9ab   : > { %1659 = vrot.lane.b32.xlu0 %v6257_v54, %s5470_s25  ;;  %1662 = vrot.lane.b32.xlu1 %v6259_v55, %s5470_s25 }
 0x9af   : > { %1665 = vrot.lane.b32.xlu0 %v6261_v56, %s5470_s25  ;;  %1668 = vrot.lane.b32.xlu1 %v6263_v57, %s5470_s25 }
 0xa15   : > { %v1648_v60 = vpop.permute.xlu0 %1647  ;;  %v1654_v27 = vpop.permute.xlu1 %1653 }
 0xa16   : > { %v1649_v61 = vsel %vm1646_vm2, %v1648_v60, %v6249_v24  ;;  %v1655_v5 = vsel %vm1646_vm2, %v1654_v27, %v6253_v52 }
 0xa17   : > { %1671 = vrot.lane.b32.xlu0 %v1649_v61, %s5470_s25 }
 0xa19   : > { %v1651_v7 = vpop.permute.xlu0 %1650  ;;  %v1657_v9 = vpop.permute.xlu1 %1656 }
 0xa1a   : > { %v1652_v11 = vsel %vm1646_vm2, %v1651_v7, %v6251_v3  ;;  %v1658_v62 = vsel %vm1646_vm2, %v1657_v9, %v6255_v53 }
 0xa1b   : > { %1673 = vrot.lane.b32.xlu1 %v1652_v11, %s5470_s25  ;;  %1675 = vrot.lane.b32.xlu0 %v1655_v5, %s5470_s25 }
 0xa1d   : > { %v1660_v63 = vpop.permute.xlu0 %1659  ;;  %v1663_v21 = vpop.permute.xlu1 %1662 }
 0xa1e   : > { %v1661_v0 = vsel %vm1646_vm2, %v1660_v63, %v6257_v54  ;;  %v1664_v20 = vsel %vm1646_vm2, %v1663_v21, %v6259_v55 }
 0xa1f   : > { %1677 = vrot.lane.b32.xlu1 %v1658_v62, %s5470_s25  ;;  %1679 = vrot.lane.b32.xlu0 %v1661_v0, %s5470_s25 }
 0xa21   : > { %v1666_v22 = vpop.permute.xlu0 %1665  ;;  %v1669_v23 = vpop.permute.xlu1 %1668 }
 0xa22   : > { %v1667_v4 = vsel %vm1646_vm2, %v1666_v22, %v6261_v56  ;;  %v1670_v19 = vsel %vm1646_vm2, %v1669_v23, %v6263_v57 }
 0xa23   : > { %1681 = vrot.lane.b32.xlu1 %v1664_v20, %s5470_s25  ;;  %1683 = vrot.lane.b32.xlu0 %v1667_v4, %s5470_s25 }
 0xa27   : > { %1685 = vrot.lane.b32.xlu1 %v1670_v19, %s5470_s25  ;;  %1698 = vperm.xlu0 %3926, %v6249_v24  }
 0xa2b   : > { %1703 = vperm.xlu1 %3927, %v6251_v3   ;;  %1713 = vperm.xlu0 %3926, %v6255_v53  }
 0xa2f   : > { %1708 = vperm.xlu1 %3927, %v6253_v52   ;;  %1723 = vperm.xlu0 %3926, %v6259_v55  }
 0xa33   : > { %1718 = vperm.xlu1 %3927, %v6257_v54   ;;  %1733 = vperm.xlu0 %3926, %v6263_v57  }
 0xa37   : > { %1728 = vperm.xlu1 %3927, %v6261_v56  }
 0xa89   : > { %v1672_v6 = vpop.permute.xlu0 %1671 }
 0xa8a   : > { %v1687_v8 = vsel %vm1646_vm2, %v1672_v6, %v6249_v24 }
 0xa8b   : > { %1744 = vrot.lane.b32.xlu1 %v1687_v8, %s5472_s5 }
 0xa8d   : > { %v1674_v10 = vpop.permute.xlu1 %1673  ;;  %v1676_v1 = vpop.permute.xlu0 %1675 }
 0xa8e   : > { %v1688_v58 = vsel %vm1646_vm2, %v1674_v10, %v6251_v3  ;;  %v1689_v59 = vsel %vm1646_vm2, %v1676_v1, %v6253_v52 }
 0xa8f   : > { %1746 = vrot.lane.b32.xlu0 %v1688_v58, %s5472_s5  ;;  %1748 = vrot.lane.b32.xlu1 %v1689_v59, %s5472_s5 }
 0xa91   : > { %v1678_v18 = vpop.permute.xlu1 %1677  ;;  %v1680_v17 = vpop.permute.xlu0 %1679 }
 0xa92   : > { %v1690_v16 = vsel %vm1646_vm2, %v1678_v18, %v6255_v53  ;;  %v1691_v15 = vsel %vm1646_vm2, %v1680_v17, %v6257_v54 }
 0xa93   : > { %1750 = vrot.lane.b32.xlu0 %v1690_v16, %s5472_s5  ;;  %1752 = vrot.lane.b32.xlu1 %v1691_v15, %s5472_s5 }
 0xa95   : > { %v1682_v14 = vpop.permute.xlu1 %1681  ;;  %v1684_v13 = vpop.permute.xlu0 %1683 }
 0xa96   : > { %v1692_v12 = vsel %vm1646_vm2, %v1682_v14, %v6259_v55  ;;  %v1693_v28 = vsel %vm1646_vm2, %v1684_v13, %v6261_v56 }
 0xa97   : > { %1754 = vrot.lane.b32.xlu0 %v1692_v12, %s5472_s5  ;;  %1756 = vrot.lane.b32.xlu1 %v1693_v28, %s5472_s5 }
 0xa99   : > { %v1686_v29 = vpop.permute.xlu1 %1685 }
 0xa9a   : > { %v1694_v30 = vsel %vm1646_vm2, %v1686_v29, %v6263_v57 }
 0xa9b   : > { %1758 = vrot.lane.b32.xlu0 %v1694_v30, %s5472_s5 }
 0xaa6   : > { %v1699_v32 = vpop.permute.xlu0 %1698 }
 0xaaa   : > { %v1704_v31 = vpop.permute.xlu1 %1703  ;;  %v1714_v34 = vpop.permute.xlu0 %1713 }
 0xaae   : > { %v1709_v33 = vpop.permute.xlu1 %1708  ;;  %v1724_v44 = vpop.permute.xlu0 %1723 }
 0xab2   : > { %v1719_v35 = vpop.permute.xlu1 %1718  ;;  %v1734_v46 = vpop.permute.xlu0 %1733 }
 0xab6   : > { %v1729_v45 = vpop.permute.xlu1 %1728 }
 0xafd   : > { %v1745_v47 = vpop.permute.xlu1 %1744 }
 0xafe   : > { %v1768_v32 = vsel %vm1695_vm3, %v1699_v32, %v1745_v47  }
 0xb01   : > { %v1749_v48 = vpop.permute.xlu1 %1748  ;;  %v1747_v49 = vpop.permute.xlu0 %1746 }
 0xb02   : > { %v1770_v30 = vsel %vm1695_vm3, %v1709_v33, %v1749_v48   ;;  %v1769_v31 = vsel %vm1695_vm3, %v1704_v31, %v1747_v49  }
 0xb05   : > { %v1753_v50 = vpop.permute.xlu1 %1752  ;;  %v1751_v51 = vpop.permute.xlu0 %1750 }
 0xb06   : > { %v1772_v28 = vsel %vm1695_vm3, %v1719_v35, %v1753_v50   ;;  %v1771_v29 = vsel %vm1695_vm3, %v1714_v34, %v1751_v51  }
 0xb09   : > { %v1757_v36 = vpop.permute.xlu1 %1756  ;;  %v1755_v37 = vpop.permute.xlu0 %1754 }
 0xb0a   : > { %v1774_v58 = vsel %vm1695_vm3, %v1729_v45, %v1757_v36   ;;  %v1773_v59 = vsel %vm1695_vm3, %v1724_v44, %v1755_v37  }
 0xb0d   : > { %v1759_v25 = vpop.permute.xlu0 %1758 }
 0xb0e   : > { %v1775_v12 = vsel %vm1695_vm3, %v1734_v46, %v1759_v25  }
 0xb0f PF: > { %v7708_v1 = vmov %v5354_v12  ;;  %v7709_v19 = vmov %v5358_v58  ;;  %v7710_v18 = vmov %v5362_v59  ;;  %v7711_v17 = vmov %v5366_v28  ;;  %v5382_v32 = vphi %v5350_v32, %v1768_v32   ;;  %v5378_v31 = vphi %v5346_v31, %v1769_v31   ;;  %v5374_v30 = vphi %v5342_v30, %v1770_v30   ;;  %v5370_v29 = vphi %v5338_v29, %v1771_v29   ;;  %v5366_v28 = vphi %v5334_v28, %v1772_v28   ;;  %v5362_v59 = vphi %v5330_v59, %v1773_v59   ;;  %v5358_v58 = vphi %v5326_v58, %v1774_v58   ;;  %v5354_v12 = vphi %v5322_v12, %v1775_v12  }
 0xb10   : > { %v7712_v16 = vmov %v5370_v29  ;;  %v7713_v15 = vmov %v5374_v30  ;;  %v7714_v14 = vmov %v5378_v31  ;;  %v7715_v13 = vmov %v5382_v32 }
 0xb11 PF: > { %1794 = sbr.rel (%p702_p9) target bundleno = 3198 (0xc7e), region = 160  ;;  %s5473_s28 = smov (!%p702_p9), 16   ;;  %v5474_v26 = vmov (!%p702_p9), 0   ;;  %vm1795_vm4 = vcmask (!%p702_p9), 1047680   ;;  %vm1844_vm5 = vcmp.lt.s32.totalorder (!%p702_p9), %v5622_v2, 4  ;;  %v5414_v13 = vphi %v6280_v13, %v7715_v13   ;;  %v5410_v14 = vphi %v6278_v14, %v7714_v14   ;;  %v5406_v15 = vphi %v6276_v15, %v7713_v15   ;;  %v5402_v16 = vphi %v6274_v16, %v7712_v16   ;;  %v5398_v17 = vphi %v6272_v17, %v7711_v17   ;;  %v5394_v18 = vphi %v6270_v18, %v7710_v18   ;;  %v5390_v19 = vphi %v6268_v19, %v7709_v19   ;;  %v5386_v1 = vphi %v6266_v1, %v7708_v1  }
 0xb12   : > { %1796 = vrot.lane.b32.xlu0 (!%p702_p9), %v6249_v24, %s5473_s28  ;;  %1802 = vrot.lane.b32.xlu1 (!%p702_p9), %v6253_v52, %s5473_s28  ;;  %s5475_s15 = smov (!%p702_p9), 116  }
 0xb13   : > { %3929 = vset.pattern.permute.xlu1 (!%p702_p9), %v5474_v26  ;;  %3928 = vset.pattern.permute.xlu0 (!%p702_p9), %v5474_v26 }
 0xb16   : > { %1799 = vrot.lane.b32.xlu0 (!%p702_p9), %v6251_v3, %s5473_s28  ;;  %1805 = vrot.lane.b32.xlu1 (!%p702_p9), %v6255_v53, %s5473_s28 }
 0xb1a   : > { %1808 = vrot.lane.b32.xlu0 %v6257_v54, %s5473_s28  ;;  %1811 = vrot.lane.b32.xlu1 %v6259_v55, %s5473_s28 }
 0xb1e   : > { %1814 = vrot.lane.b32.xlu0 %v6261_v56, %s5473_s28  ;;  %1817 = vrot.lane.b32.xlu1 %v6263_v57, %s5473_s28 }
 0xb84   : > { %v1797_v38 = vpop.permute.xlu0 %1796  ;;  %v1803_v39 = vpop.permute.xlu1 %1802 }
 0xb85   : > { %v1798_v40 = vsel %vm1795_vm4, %v1797_v38, %v6249_v24  ;;  %v1804_v41 = vsel %vm1795_vm4, %v1803_v39, %v6253_v52 }
 0xb86   : > { %1820 = vrot.lane.b32.xlu0 %v1798_v40, %s5473_s28 }
 0xb88   : > { %v1800_v42 = vpop.permute.xlu0 %1799  ;;  %v1806_v43 = vpop.permute.xlu1 %1805 }
 0xb89   : > { %v1801_v60 = vsel %vm1795_vm4, %v1800_v42, %v6251_v3  ;;  %v1807_v27 = vsel %vm1795_vm4, %v1806_v43, %v6255_v53 }
 0xb8a   : > { %1822 = vrot.lane.b32.xlu1 %v1801_v60, %s5473_s28  ;;  %1824 = vrot.lane.b32.xlu0 %v1804_v41, %s5473_s28 }
 0xb8c   : > { %v1809_v61 = vpop.permute.xlu0 %1808  ;;  %v1812_v5 = vpop.permute.xlu1 %1811 }
 0xb8d   : > { %v1810_v7 = vsel %vm1795_vm4, %v1809_v61, %v6257_v54  ;;  %v1813_v9 = vsel %vm1795_vm4, %v1812_v5, %v6259_v55 }
 0xb8e   : > { %1826 = vrot.lane.b32.xlu1 %v1807_v27, %s5473_s28  ;;  %1828 = vrot.lane.b32.xlu0 %v1810_v7, %s5473_s28 }
 0xb90   : > { %v1815_v11 = vpop.permute.xlu0 %1814  ;;  %v1818_v62 = vpop.permute.xlu1 %1817 }
 0xb91   : > { %v1816_v63 = vsel %vm1795_vm4, %v1815_v11, %v6261_v56  ;;  %v1819_v21 = vsel %vm1795_vm4, %v1818_v62, %v6263_v57 }
 0xb92   : > { %1830 = vrot.lane.b32.xlu1 %v1813_v9, %s5473_s28  ;;  %1832 = vrot.lane.b32.xlu0 %v1816_v63, %s5473_s28 }
 0xb96   : > { %1834 = vrot.lane.b32.xlu1 %v1819_v21, %s5473_s28  ;;  %1847 = vperm.xlu0 %3928, %v6249_v24  }
 0xb9a   : > { %1852 = vperm.xlu1 %3929, %v6251_v3   ;;  %1862 = vperm.xlu0 %3928, %v6255_v53  }
 0xb9e   : > { %1857 = vperm.xlu1 %3929, %v6253_v52   ;;  %1872 = vperm.xlu0 %3928, %v6259_v55  }
 0xba2   : > { %1867 = vperm.xlu1 %3929, %v6257_v54   ;;  %1882 = vperm.xlu0 %3928, %v6263_v57  }
 0xba6   : > { %1877 = vperm.xlu1 %3929, %v6261_v56  }
 0xbf8   : > { %v1821_v0 = vpop.permute.xlu0 %1820 }
 0xbf9   : > { %v1836_v20 = vsel %vm1795_vm4, %v1821_v0, %v6249_v24 }
 0xbfa   : > { %1893 = vrot.lane.b32.xlu1 %v1836_v20, %s5475_s15 }
 0xbfc   : > { %v1823_v22 = vpop.permute.xlu1 %1822  ;;  %v1825_v23 = vpop.permute.xlu0 %1824 }
 0xbfd   : > { %v1837_v4 = vsel %vm1795_vm4, %v1823_v22, %v6251_v3  ;;  %v1838_v19 = vsel %vm1795_vm4, %v1825_v23, %v6253_v52 }
 0xbfe   : > { %1895 = vrot.lane.b32.xlu0 %v1837_v4, %s5475_s15  ;;  %1897 = vrot.lane.b32.xlu1 %v1838_v19, %s5475_s15 }
 0xc00   : > { %v1827_v6 = vpop.permute.xlu1 %1826  ;;  %v1829_v8 = vpop.permute.xlu0 %1828 }
 0xc01   : > { %v1839_v10 = vsel %vm1795_vm4, %v1827_v6, %v6255_v53  ;;  %v1840_v24 = vsel %vm1795_vm4, %v1829_v8, %v6257_v54 }
 0xc02   : > { %1899 = vrot.lane.b32.xlu0 %v1839_v10, %s5475_s15  ;;  %1901 = vrot.lane.b32.xlu1 %v1840_v24, %s5475_s15 }
 0xc04   : > { %v1831_v1 = vpop.permute.xlu1 %1830  ;;  %v1833_v58 = vpop.permute.xlu0 %1832 }
 0xc05   : > { %v1841_v3 = vsel %vm1795_vm4, %v1831_v1, %v6259_v55  ;;  %v1842_v52 = vsel %vm1795_vm4, %v1833_v58, %v6261_v56 }
 0xc06   : > { %1903 = vrot.lane.b32.xlu0 %v1841_v3, %s5475_s15  ;;  %1905 = vrot.lane.b32.xlu1 %v1842_v52, %s5475_s15 }
 0xc08   : > { %v1835_v59 = vpop.permute.xlu1 %1834 }
 0xc09   : > { %v1843_v18 = vsel %vm1795_vm4, %v1835_v59, %v6263_v57 }
 0xc0a   : > { %1907 = vrot.lane.b32.xlu0 %v1843_v18, %s5475_s15 }
 0xc15   : > { %v1848_v17 = vpop.permute.xlu0 %1847 }
 0xc19   : > { %v1853_v53 = vpop.permute.xlu1 %1852  ;;  %v1863_v16 = vpop.permute.xlu0 %1862 }
 0xc1d   : > { %v1858_v54 = vpop.permute.xlu1 %1857  ;;  %v1873_v14 = vpop.permute.xlu0 %1872 }
 0xc21   : > { %v1868_v15 = vpop.permute.xlu1 %1867  ;;  %v1883_v55 = vpop.permute.xlu0 %1882 }
 0xc25   : > { %v1878_v13 = vpop.permute.xlu1 %1877 }
 0xc6c   : > { %v1894_v12 = vpop.permute.xlu1 %1893 }
 0xc6d   : > { %v1917_v56 = vsel %vm1844_vm5, %v1848_v17, %v1894_v12  }
 0xc70   : > { %v1898_v28 = vpop.permute.xlu1 %1897  ;;  %v1896_v29 = vpop.permute.xlu0 %1895 }
 0xc71   : > { %v1919_v57 = vsel %vm1844_vm5, %v1858_v54, %v1898_v28   ;;  %v1918_v30 = vsel %vm1844_vm5, %v1853_v53, %v1896_v29  }
 0xc74   : > { %v1902_v31 = vpop.permute.xlu1 %1901  ;;  %v1900_v32 = vpop.permute.xlu0 %1899 }
 0xc75   : > { %v1921_v17 = vsel %vm1844_vm5, %v1868_v15, %v1902_v31   ;;  %v1920_v16 = vsel %vm1844_vm5, %v1863_v16, %v1900_v32   ;;  %v7716_v15 = vmov %v1919_v57 }
 0xc78   : > { %v1906_v33 = vpop.permute.xlu1 %1905  ;;  %v1904_v34 = vpop.permute.xlu0 %1903 }
 0xc79   : > { %v1923_v19 = vsel %vm1844_vm5, %v1878_v13, %v1906_v33   ;;  %v1922_v18 = vsel %vm1844_vm5, %v1873_v14, %v1904_v34   ;;  %v7717_v14 = vmov %v1918_v30  ;;  %v7718_v13 = vmov %v1917_v56 }
 0xc7c   : > { %v1908_v35 = vpop.permute.xlu0 %1907 }
 0xc7d   : > { %v1924_v1 = vsel %vm1844_vm5, %v1883_v55, %v1908_v35  }
 0xc7e PF: > { %vm1933_vm6 = vcmask 130048   ;;  %v5446_v13 = vphi %v5414_v13, %v7718_v13   ;;  %v5442_v14 = vphi %v5410_v14, %v7717_v14   ;;  %v5438_v15 = vphi %v5406_v15, %v7716_v15   ;;  %v5434_v16 = vphi %v5402_v16, %v1920_v16   ;;  %v5430_v17 = vphi %v5398_v17, %v1921_v17   ;;  %v5426_v18 = vphi %v5394_v18, %v1922_v18   ;;  %v5422_v19 = vphi %v5390_v19, %v1923_v19   ;;  %v5418_v1 = vphi %v5386_v1, %v1924_v1  }
 0xc7f   : > { %1934 = vst.msk [vmem:[%s5629_s16] sm:$0xff] %vm1933_vm6, %v5446_v13  ;;  %1935 = vst.msk [vmem:[%s5629_s16 + $0x8] sm:$0xff] %vm1933_vm6, %v5442_v14 }
 0xc80   : > { %1936 = vst.msk [vmem:[%s5629_s16 + $0x10] sm:$0xff] %vm1933_vm6, %v5438_v15  ;;  %1937 = vst.msk [vmem:[%s5629_s16 + $0x18] sm:$0xff] %vm1933_vm6, %v5434_v16 }
 0xc81   : > { %1938 = vst.msk [vmem:[%s5629_s16 + $0x20] sm:$0xff] %vm1933_vm6, %v5430_v17  ;;  %1939 = vst.msk [vmem:[%s5629_s16 + $0x28] sm:$0xff] %vm1933_vm6, %v5426_v18 }
 0xc82   : > { %1940 = vst.msk [vmem:[%s5629_s16 + $0x30] sm:$0xff] %vm1933_vm6, %v5422_v19  ;;  %1941 = vst.msk [vmem:[%s5629_s16 + $0x38] sm:$0xff] %vm1933_vm6, %v5418_v1 }
 0xc83 PF: > { %s2090_s4 = sshll.u32 %s5527_s0, 10  ;;  %s1956_s12 = sshll.u32 %s5629_s16, 4  ;;  %s7590_s12 = int_to_ptr.vmem [resolvable:$true] %s1956_s12 }
 0xc84   : > { %s7587_s17 = scalar_lea.hbm %s7636_s2, %s2090_s4  ;;  %s1943_s6 = scalar_lea.sflag [#allocation6], %s5610_s7 }
 0xc85   : > { %s3970_s10 = scalar_lea.vmem %s7590_s12, 1024  ;;  %p7719_p2 = scmp.ne.s32.totalorder %s7640_s30, 0 }
 0xc86   : > { %p3971_p9 = scmp.ne.s32.totalorder %s7590_s12, %s3970_s10  ;;  %s5476_s9 = smov [#allocation7]  }
 0xc87   : > { %s3974_s13 = sshll.u32 %s5476_s9, 4  ;;  %s3975_s13 = int_to_ptr.vmem [resolvable:$false] %s3974_s13 }
 0xc88   : > { %p3972_p11 = pnand %p3971_p9, %p7719_p2  ;;  %s3976_s0 = scalar_lea.vmem %s3975_s13, 2048 }
 0xc89   : > { %p3977_p3 = scmp.lt.s32.totalorder %s7590_s12, %s3975_s13  ;;  %p3978_p5 = scmp.lt.s32.totalorder %s3976_s0, %s3970_s10 }
 0xc8a   : > { %p3973_p13 = pneg %p3972_p11 }
 0xc8b   : > { %p3979_p7 = por %p3978_p5, %p3977_p3 }
 0xc8d   : > { %p3980_p8 = pnand %p3979_p7, %p3973_p13 }
 0xc8f   : > { %3983 = shalt.err (!%p3980_p8)
}
 0xc90   : > { %s3984_s16 = scalar_lea.hbm %s7587_s17, 1024  ;;  %s3988_s14 = scalar_lea.hbm %s7636_s2, 2048 }
 0xc91   : > { %p3985_p10 = scmp.ne.s32.totalorder %s7587_s17, %s3984_s16  ;;  %p3989_p6 = scmp.lt.u32.totalorder %s7587_s17, %s7636_s2 }
 0xc92   : > { %p3990_p0 = scmp.lt.u32.totalorder %s3988_s14, %s3984_s16  ;;  %p3992_p9 = scmp.lt.u32.totalorder %s3984_s16, %s7587_s17 }
 0xc93   : > { %p3986_p12 = pnand %p3985_p10, %p7719_p2 }
 0xc94   : > { %p3991_p1 = por %p3990_p0, %p3989_p6 }
 0xc95   : > { %p3987_p4 = pneg %p3986_p12 }
 0xc96   : > { %p3993_p11 = por %p3992_p9, %p3991_p1 }
 0xc98   : > { %p3994_p13 = pnand %p3993_p11, %p3987_p4 }
 0xc9a   : > { %3997 = shalt.err (!%p3994_p13)
}
 0xc9b   : > { %s5477_s25 = smov 128   ;;  %s5478_s5 = smov 8  }
 0xc9c   : > { %2423 = dma.vmem_to_hbm [thread:$0]  (%p7719_p2), %s7590_s12, 1024, %s7587_s17, %s1943_s6, %s5477_s25, %s5477_s25, %s5478_s5  }
 0xc9d PF: > { %s1971_s28 = sand.u32 1, %s4730_s19   ;;  %p7720_p3 = scmp.ne.s32.totalorder %s7641_s3, 0 }
 0xc9e   : > { %p7721_p5 = scmp.ge.s32.totalorder %s4742_s22, 2  ;;  %s1972_s15 = scalar_lea.sflag [#allocation6], %s1971_s28 }
 0xca0   : > { %p2430_p7 = pnand %p7721_p5, %p7720_p3 }
 0xca2   : > { %4725 = dma.done.wait (!%p2430_p7), %s1972_s15, 1024  }
 0xca3   : > { %4727 = vsyncadd (!%p2430_p7), %s1972_s15, 4294966272  ;;  %p19_p8 = scmp.ge.s32.totalorder %s5531_s24, 4   ;;  %s7722_s19 = smov %s4734_s20 }
 0xca4   : > { %s7723_s20 = smov %s4738_s21  ;;  %s7724_s21 = smov %s5543_s27 }
 0xca5   : > { %s7725_s22 = smov %s5531_s24  ;;  %21 = sbr.rel (!%p19_p8) target bundleno = 17 (0x11), region = 201 }
 0xcac   :  { %1977 = vsyncpa [#allocation5], 1 }
 0xcad   :  { %1979 = vsyncpa [#allocation5 + $0x1], 1 }
 0xcae   :  { %1980 = vsyncpa [#allocation6], 1 }
 0xcaf   :  { %1982 = vsyncpa [#allocation6 + $0x1], 1 }

</bundles_post_ra>
